<compile_context>
chip_gen: v5e
topology: v5e:2x2
jax: 0.10.0
libtpu: 0.0.40
codegen_flags: <defaults>
</compile_context>

<pallas_src>
import jax
import jax.numpy as jnp
from jax.experimental import pallas as pl
from jax.experimental.pallas import tpu as pltpu


def _matmul_bias_tanh_kernel(a_ref, w_ref, b_ref, o_ref):
    # a_ref: (1, K, TM) bf16 im2col patch block of one batch element
    # w_ref: (Cout, K)  bf16 reshaped conv weight (resident across M blocks)
    # b_ref: (Cout, 1)  f32 bias
    # o_ref: (1, Cout, TM) f32 output block (lane-dense last dim)
    acc = jnp.dot(w_ref[...], a_ref[0], preferred_element_type=jnp.float32)
    o_ref[0] = jnp.tanh(acc + b_ref[...])


def _is_dual_tensorcore_chip() -> bool:
    """True on chips with 2 TensorCores (v7x); False (safe default) otherwise."""
    try:
        kind = jax.devices()[0].device_kind.lower()
    except Exception:
        return False
    return ("v7" in kind) or ("7x" in kind)


_DUAL_TC = _is_dual_tensorcore_chip()


def _conv2d_tanh(x, w, b, stride, padding):
    """x: (N, Cin, H, W) NCHW.  w: (Cout, Cin, KH, KW).  b: (Cout,).
    Returns (N, Cout, Hout, Wout) NCHW, matching PyTorch Conv2d + tanh."""
    N, Cin, H, W = x.shape
    Cout, Cin_w, KH, KW = w.shape
    assert Cin == Cin_w
    sh, sw = stride
    ph, pw = padding
    Hout = (H + 2 * ph - KH) // sh + 1
    Wout = (W + 2 * pw - KW) // sw + 1
    K = Cin * KH * KW
    M = Hout * Wout

    # ---- im2col: one fused XLA op, bf16, feature order (Cin, KH, KW) ----
    patches = jax.lax.conv_general_dilated_patches(
        x.astype(jnp.bfloat16), (KH, KW), (sh, sw),
        padding=((ph, ph), (pw, pw)))              # (N, K, Hout, Wout)
    A = patches.reshape(N, K, M)                   # contiguous flatten (no copy)

    Wm = w.reshape(Cout, K).astype(jnp.bfloat16)   # (Cout, K)
    Bm = b.reshape(Cout, 1).astype(jnp.float32)    # (Cout, 1)

    # M tiling: split only on dual-TC chips (v7x) so the second core is used;
    # a single block per batch element elsewhere (per-step overhead ~= the
    # overlap gain on single-TC chips).
    if _DUAL_TC and M > 256:
        tm = 256
    else:
        tm = M
    num_m = pl.cdiv(M, tm)

    cost = pl.CostEstimate(
        flops=2 * N * Cout * K * M,
        transcendentals=N * Cout * M,
        bytes_accessed=(N * K * M * 2          # A (bf16)
                        + Cout * K * 2          # W (bf16)
                        + Cout * 4              # bias (f32)
                        + N * Cout * M * 4),    # out (f32)
    )

    # ---- Pallas: (Cout, K) @ (K, TM) + bias, tanh -- lane-dense output ----
    out = pl.pallas_call(
        _matmul_bias_tanh_kernel,
        out_shape=jax.ShapeDtypeStruct((N, Cout, M), jnp.float32),
        grid=(N, num_m),
        in_specs=[
            pl.BlockSpec((1, K, tm), lambda n, m: (n, 0, m)),
            pl.BlockSpec((Cout, K), lambda n, m: (0, 0)),
            pl.BlockSpec((Cout, 1), lambda n, m: (0, 0)),
        ],
        out_specs=pl.BlockSpec((1, Cout, tm), lambda n, m: (n, 0, m)),
        compiler_params=pltpu.CompilerParams(
            dimension_semantics=("parallel", "parallel"),
            # Let XLA fuse/schedule the patches producer into operand 0 when
            # it can (best-effort; harmless no-op for a conv producer).
            allow_input_fusion=[True, False, False]),
        cost_estimate=cost,
    )(A, Wm, Bm)

    # (N, Cout, M) -> (N, Cout, Hout, Wout): pure reshape, no transpose.
    return out.reshape(N, Cout, Hout, Wout)


conv2d_tanh = jax.jit(_conv2d_tanh, static_argnames=("stride", "padding"))


if __name__ == "__main__":
    key = jax.random.PRNGKey(0)
    kx, kw, kb = jax.random.split(key, 3)

    # Input shape implied by the module: (1, 3, 64, 64), NCHW.
    x = jax.random.normal(kx, (1, 3, 64, 64), dtype=jnp.float32)

    # Deterministic synthetic parameters for Conv2d(3, 20, 18).
    Cout, Cin, KH, KW = 20, 3, 18, 18
    fan_in = Cin * KH * KW
    bound = 1.0 / (fan_in ** 0.5)
    w = jax.random.uniform(kw, (Cout, Cin, KH, KW), jnp.float32, -bound, bound)
    b = jax.random.uniform(kb, (Cout,), jnp.float32, -bound, bound)

    y = conv2d_tanh(x, w, b, stride=(3, 2), padding=(1, 2))
    y = jax.block_until_ready(y)

    # Sanity check against XLA's native convolution (full f32 reference).
    ref = jax.lax.conv_general_dilated(
        x, w, window_strides=(3, 2), padding=((1, 1), (2, 2)),
        dimension_numbers=("NCHW", "OIHW", "NCHW"),
        precision=jax.lax.Precision.HIGHEST)
    ref = jnp.tanh(ref + b.reshape(1, Cout, 1, 1))

    assert y.shape == (1, 20, 17, 26), y.shape
    # Tolerance accounts for bf16 MXU inputs (f32 accumulation); real layout /
    # ordering bugs would produce O(0.1..1) errors and still be caught.
    err = float(jnp.max(jnp.abs(y - ref)))
    assert jnp.allclose(y, ref, atol=2e-2, rtol=2e-2), err

    print("KERNEL_OK")
</pallas_src>

<mosaic_0001>
module attributes {stable_mosaic.version = 11 : i64} {
  func.func @_matmul_bias_tanh_kernel(%arg0: i32, %arg1: i32, %arg2: memref<1x972x442xbf16, #tpu.memory_space<vmem>>, %arg3: memref<20x972xbf16, #tpu.memory_space<vmem>>, %arg4: memref<20x1xf32, #tpu.memory_space<vmem>>, %arg5: memref<1x20x442xf32, #tpu.memory_space<vmem>>) attributes {dimension_semantics = [#tpu.dimension_semantics<parallel>, #tpu.dimension_semantics<parallel>], iteration_bounds = array<i64: 1, 1>, scalar_prefetch = 0 : i64, scratch_operands = 0 : i64, tpu.core_type = #tpu.core_type<tc>, window_params = [{transform_indices = @transform_0, window_bounds = array<i64: 1, 972, 442>}, {pipeline_mode = #tpu.pipeline_mode<synchronous>, transform_indices = @transform_1, window_bounds = array<i64: 20, 972>}, {pipeline_mode = #tpu.pipeline_mode<synchronous>, transform_indices = @transform_2, window_bounds = array<i64: 20, 1>}, {transform_indices = @transform_3, window_bounds = array<i64: 1, 20, 442>}]} {
    %c0 = arith.constant 0 : index
    %c0_0 = arith.constant 0 : index
    %0 = vector.load %arg3[%c0, %c0_0] : memref<20x972xbf16, #tpu.memory_space<vmem>>, vector<20x972xbf16>
    %c0_1 = arith.constant 0 : index
    %c0_2 = arith.constant 0 : index
    %c0_3 = arith.constant 0 : index
    %1 = vector.load %arg2[%c0_1, %c0_2, %c0_3] : memref<1x972x442xbf16, #tpu.memory_space<vmem>>, vector<1x972x442xbf16>
    %2 = vector.shape_cast %1 : vector<1x972x442xbf16> to vector<972x442xbf16>
    %cst = arith.constant dense<0.000000e+00> : vector<20x442xf32>
    %3 = tpu.matmul %0, %2, %cst {dimension_numbers = #tpu.dot_dimension_numbers<[1], [0], [0], [1], [0, 0, 1, 1], [], []>} : vector<20x972xbf16>, vector<972x442xbf16>, vector<20x442xf32> -> vector<20x442xf32>
    %c0_4 = arith.constant 0 : index
    %c0_5 = arith.constant 0 : index
    %4 = vector.load %arg4[%c0_4, %c0_5] : memref<20x1xf32, #tpu.memory_space<vmem>>, vector<20x1xf32>
    %5 = vector.broadcast %4 : vector<20x1xf32> to vector<20x442xf32>
    %6 = arith.addf %3, %5 : vector<20x442xf32>
    %7 = math.tanh %6 : vector<20x442xf32>
    %c0_6 = arith.constant 0 : index
    %c0_7 = arith.constant 0 : index
    %c0_8 = arith.constant 0 : index
    %8 = vector.load %arg5[%c0_6, %c0_7, %c0_8] : memref<1x20x442xf32, #tpu.memory_space<vmem>>, vector<1x20x442xf32>
    %9 = vector.shape_cast %8 : vector<1x20x442xf32> to vector<20x442xf32>
    %10 = vector.shape_cast %7 : vector<20x442xf32> to vector<1x20x442xf32>
    tpu.vector_store %arg5[%c0_6, %c0_7, %c0_8], %10 {strides = array<i32>} : memref<1x20x442xf32, #tpu.memory_space<vmem>>, vector<1x20x442xf32>,
    return
  }
  func.func @transform_0(%arg0: i32, %arg1: i32) -> (i32, i32, i32) {
    %c0_i32 = arith.constant 0 : i32
    %c0_i32_0 = arith.constant 0 : i32
    return %arg0, %c0_i32, %arg1 : i32, i32, i32
  }
  func.func @transform_1(%arg0: i32, %arg1: i32) -> (i32, i32) {
    %c0_i32 = arith.constant 0 : i32
    %c0_i32_0 = arith.constant 0 : i32
    %c0_i32_1 = arith.constant 0 : i32
    return %c0_i32, %c0_i32_0 : i32, i32
  }
  func.func @transform_2(%arg0: i32, %arg1: i32) -> (i32, i32) {
    %c0_i32 = arith.constant 0 : i32
    %c0_i32_0 = arith.constant 0 : i32
    %c0_i32_1 = arith.constant 0 : i32
    return %c0_i32, %c0_i32_0 : i32, i32
  }
  func.func @transform_3(%arg0: i32, %arg1: i32) -> (i32, i32, i32) {
    %c0_i32 = arith.constant 0 : i32
    %c0_i32_0 = arith.constant 0 : i32
    return %arg0, %c0_i32, %arg1 : i32, i32, i32
  }
}

</mosaic_0001>

<bundles_post_ra>
// kernel: _conv2d_tanh.1
= control target key start
LH: loop header
LB: loop body
LE: loop exit
PB: predicated region body
PF: predicated region fallthrough
CT: control target
= control target key end

     0   :  { %vm1578_vm0 = vcmask 1045504   ;;  %vm1571_vm1 = vcmask 621568   ;;  %vm2182_vm2 = vcmask 474112   ;;  %vm2191_vm3 = vcmask 470016   ;;  %s5252_s0 = inlined_call_operand.vmem [shape: bf16[1,972,442], index: 0, kind: input, shape index: {}]   ;;  %s5253_s1 = inlined_call_operand.vmem [shape: bf16[20,972], index: 1, kind: input, shape index: {}]   ;;  %s5254_s2 = inlined_call_operand.vmem [shape: f32[20,1], index: 2, kind: input, shape index: {}]   ;;  %s5255_s3 = inlined_call_operand.vmem [shape: f32[1,20,442], index: 3, kind: output, shape index: {}]  }
   0x1   :  { %v2343_v0 = vld [vmem:[%s5252_s0 + $0xe0] sm:$0xf]  ;;  %v3251_v1 = vld [vmem:[%s5252_s0 + $0xec] sm:$0xf0] }
   0x2   :  { %v2471_v2 = vld [vmem:[%s5252_s0 + $0x1e0] sm:$0xf]  ;;  %v2344_v3 = vor.u32 %v3251_v1, %v2343_v0  ;;  %v3283_v4 = vld [vmem:[%s5252_s0 + $0x1ec] sm:$0xf0] }
   0x3   :  { %v2599_v5 = vld [vmem:[%s5252_s0 + $0x2e0] sm:$0xf]  ;;  %v3315_v6 = vld [vmem:[%s5252_s0 + $0x2ec] sm:$0xf0]  ;;  %v2472_v7 = vor.u32 %v3283_v4, %v2471_v2 }
   0x4   :  { %v2600_v8 = vor.u32 %v3315_v6, %v2599_v5  ;;  %v2727_v9 = vld [vmem:[%s5252_s0 + $0x3e0] sm:$0xf]  ;;  %v3347_v10 = vld [vmem:[%s5252_s0 + $0x3ec] sm:$0xf0]  ;;  %1591 = vmatpush.bf16.msra.mxu0 %v2344_v3 }
   0x5   :  { %v2327_v11 = vld [vmem:[%s5252_s0 + $0xc0] sm:$0xf]  ;;  %v2728_v12 = vor.u32 %v3347_v10, %v2727_v9  ;;  %v3247_v13 = vld [vmem:[%s5252_s0 + $0xcc] sm:$0xf0]  ;;  %1609 = vmatpush.bf16.msra.mxu1 %v2472_v7 }
   0x6   :  { %v2455_v14 = vld [vmem:[%s5252_s0 + $0x1c0] sm:$0xf]  ;;  %v3279_v15 = vld [vmem:[%s5252_s0 + $0x1cc] sm:$0xf0]  ;;  %1627 = vmatpush.bf16.msra.mxu2 %v2600_v8  ;;  %v2328_v16 = vor.u32 %v3247_v13, %v2327_v11 }
   0x7   :  { %v2456_v17 = vor.u32 %v3279_v15, %v2455_v14  ;;  %v2583_v18 = vld [vmem:[%s5252_s0 + $0x2c0] sm:$0xf]  ;;  %v3311_v19 = vld [vmem:[%s5252_s0 + $0x2cc] sm:$0xf0]  ;;  %1645 = vmatpush.bf16.msra.mxu3 %v2728_v12 }
   0x8   :  { %v2711_v20 = vld [vmem:[%s5252_s0 + $0x3c0] sm:$0xf]  ;;  %v2584_v21 = vor.u32 %v3311_v19, %v2583_v18  ;;  %v3343_v22 = vld [vmem:[%s5252_s0 + $0x3cc] sm:$0xf0]  ;;  %1592 = vmatpush.bf16.msra.mxu0 %v2328_v16 }
   0x9   :  { %v2311_v23 = vld [vmem:[%s5252_s0 + $0xa0] sm:$0xf]  ;;  %v3243_v24 = vld [vmem:[%s5252_s0 + $0xac] sm:$0xf0]  ;;  %v2712_v25 = vor.u32 %v3343_v22, %v2711_v20  ;;  %1610 = vmatpush.bf16.msra.mxu1 %v2456_v17 }
   0xa   :  { %v2439_v26 = vld [vmem:[%s5252_s0 + $0x1a0] sm:$0xf]  ;;  %v3275_v27 = vld [vmem:[%s5252_s0 + $0x1ac] sm:$0xf0]  ;;  %v2312_v29 = vor.u32 %v3243_v24, %v2311_v23  ;;  %1628 = vmatpush.bf16.msra.mxu2 %v2584_v21 }
   0xb   :  { %v2567_v28 = vld [vmem:[%s5252_s0 + $0x2a0] sm:$0xf]  ;;  %v3307_v30 = vld [vmem:[%s5252_s0 + $0x2ac] sm:$0xf0]  ;;  %v2440_v33 = vor.u32 %v3275_v27, %v2439_v26  ;;  %1646 = vmatpush.bf16.msra.mxu3 %v2712_v25 }
   0xc   :  { %v2695_v31 = vld [vmem:[%s5252_s0 + $0x3a0] sm:$0xf]  ;;  %v3339_v32 = vld [vmem:[%s5252_s0 + $0x3ac] sm:$0xf0]  ;;  %v2568_v34 = vor.u32 %v3307_v30, %v2567_v28  ;;  %1593 = vmatpush.bf16.msra.mxu0 %v2312_v29 }
   0xd   :  { %v2295_v35 = vld [vmem:[%s5252_s0 + $0x80] sm:$0xf]  ;;  %v3239_v36 = vld [vmem:[%s5252_s0 + $0x8c] sm:$0xf0]  ;;  %v2696_v38 = vor.u32 %v3339_v32, %v2695_v31  ;;  %1611 = vmatpush.bf16.msra.mxu1 %v2440_v33  ;;  %v3213_v32 = vld [vmem:[%s5253_s1 + $0x4] sm:$0xf] }
   0xe   :  { %v2423_v37 = vld [vmem:[%s5252_s0 + $0x180] sm:$0xf]  ;;  %v3271_v39 = vld [vmem:[%s5252_s0 + $0x18c] sm:$0xf0]  ;;  %v2296_v44 = vor.u32 %v3239_v36, %v2295_v35  ;;  %1629 = vmatpush.bf16.msra.mxu2 %v2568_v34  ;;  %v2201_v33 = vld [vmem:[%s5253_s1 + $0x20] sm:$0xf0] }
   0xf   :  { %v2551_v40 = vld [vmem:[%s5252_s0 + $0x280] sm:$0xf]  ;;  %v3303_v41 = vld [vmem:[%s5252_s0 + $0x28c] sm:$0xf0]  ;;  %v2424_v45 = vor.u32 %v3271_v39, %v2423_v37  ;;  %1647 = vmatpush.bf16.msra.mxu3 %v2696_v38  ;;  %v2207_v37 = vld [vmem:[%s5253_s1 + $0x8] sm:$0xf] }
  0x10   :  { %v2679_v42 = vld [vmem:[%s5252_s0 + $0x380] sm:$0xf]  ;;  %v3335_v43 = vld [vmem:[%s5252_s0 + $0x38c] sm:$0xf0]  ;;  %v2552_v46 = vor.u32 %v3303_v41, %v2551_v40  ;;  %1594 = vmatpush.bf16.msra.mxu0 %v2296_v44  ;;  %v3492_v40 = vmov 0  }
  0x11   :  { %v2279_v47 = vld [vmem:[%s5252_s0 + $0x60] sm:$0xf]  ;;  %v3235_v48 = vld [vmem:[%s5252_s0 + $0x6c] sm:$0xf0]  ;;  %v2680_v50 = vor.u32 %v3335_v43, %v2679_v42  ;;  %1612 = vmatpush.bf16.msra.mxu1 %v2424_v45  ;;  %3466 = vset.pattern.permute.xlu0 %v3492_v40  ;;  %v3218_v43 = vld [vmem:[%s5253_s1 + $0x24] sm:$0xf0] }
  0x12   :  { %v2407_v49 = vld [vmem:[%s5252_s0 + $0x160] sm:$0xf]  ;;  %v3267_v51 = vld [vmem:[%s5252_s0 + $0x16c] sm:$0xf0]  ;;  %v2280_v56 = vor.u32 %v3235_v48, %v2279_v47  ;;  %1630 = vmatpush.bf16.msra.mxu2 %v2552_v46  ;;  %v3214_v44 = vld [vmem:[%s5253_s1 + $0xc] sm:$0xf]  ;;  %3467 = vset.pattern.permute.xlu1 %v3492_v40 }
  0x13   :  { %v2535_v52 = vld [vmem:[%s5252_s0 + $0x260] sm:$0xf]  ;;  %v3299_v53 = vld [vmem:[%s5252_s0 + $0x26c] sm:$0xf0]  ;;  %v2408_v57 = vor.u32 %v3267_v51, %v2407_v49  ;;  %1648 = vmatpush.bf16.msra.mxu3 %v2680_v50  ;;  %v2209_v45 = vld [vmem:[%s5253_s1 + $0x28] sm:$0xf0] }
  0x14   :  { %v2663_v54 = vld [vmem:[%s5252_s0 + $0x360] sm:$0xf]  ;;  %v3331_v55 = vld [vmem:[%s5252_s0 + $0x36c] sm:$0xf0]  ;;  %v2536_v58 = vor.u32 %v3299_v53, %v2535_v52  ;;  %1595 = vmatpush.bf16.msra.mxu0 %v2280_v56  ;;  %v3764_v56 = vor.u32 %v3213_v32, %v2201_v33 }
  0x15   :  { %v2263_v59 = vld [vmem:[%s5252_s0 + $0x40] sm:$0xf]  ;;  %v3231_v60 = vld [vmem:[%s5252_s0 + $0x4c] sm:$0xf0]  ;;  %v2664_v62 = vor.u32 %v3331_v55, %v2663_v54  ;;  %1613 = vmatpush.bf16.msra.mxu1 %v2408_v57  ;;  %v3766_v57 = vor.u32 %v3218_v43, %v2207_v37 }
  0x16   :  { %v2391_v61 = vld [vmem:[%s5252_s0 + $0x140] sm:$0xf]  ;;  %v3263_v63 = vld [vmem:[%s5252_s0 + $0x14c] sm:$0xf0]  ;;  %v2264_v4 = vor.u32 %v3231_v60, %v2263_v59  ;;  %1631 = vmatpush.bf16.msra.mxu2 %v2536_v58  ;;  %v3774_v60 = vor.u32 %v3214_v44, %v2209_v45 }
  0x17   :  { %v2519_v0 = vld [vmem:[%s5252_s0 + $0x240] sm:$0xf]  ;;  %v3295_v1 = vld [vmem:[%s5252_s0 + $0x24c] sm:$0xf0]  ;;  %v2392_v6 = vor.u32 %v3263_v63, %v2391_v61  ;;  %1649 = vmatpush.bf16.msra.mxu3 %v2664_v62 }
  0x18   :  { %v2647_v2 = vld [vmem:[%s5252_s0 + $0x340] sm:$0xf]  ;;  %v3327_v3 = vld [vmem:[%s5252_s0 + $0x34c] sm:$0xf0]  ;;  %v2520_v7 = vor.u32 %v3295_v1, %v2519_v0  ;;  %1596 = vmatpush.bf16.msra.mxu0 %v2264_v4 }
  0x19   :  { %v2247_v5 = vld [vmem:[%s5252_s0 + $0x20] sm:$0xf]  ;;  %v3227_v8 = vld [vmem:[%s5252_s0 + $0x2c] sm:$0xf0]  ;;  %v2648_v11 = vor.u32 %v3327_v3, %v2647_v2  ;;  %1614 = vmatpush.bf16.msra.mxu1 %v2392_v6 }
  0x1a   :  { %v2375_v9 = vld [vmem:[%s5252_s0 + $0x120] sm:$0xf]  ;;  %v3259_v10 = vld [vmem:[%s5252_s0 + $0x12c] sm:$0xf0]  ;;  %v2248_v18 = vor.u32 %v3227_v8, %v2247_v5  ;;  %1632 = vmatpush.bf16.msra.mxu2 %v2520_v7 }
  0x1b   :  { %v2503_v12 = vld [vmem:[%s5252_s0 + $0x220] sm:$0xf]  ;;  %v3291_v13 = vld [vmem:[%s5252_s0 + $0x22c] sm:$0xf0]  ;;  %v2376_v22 = vor.u32 %v3259_v10, %v2375_v9  ;;  %1650 = vmatpush.bf16.msra.mxu3 %v2648_v11 }
  0x1c   :  { %v2631_v14 = vld [vmem:[%s5252_s0 + $0x320] sm:$0xf]  ;;  %v3323_v15 = vld [vmem:[%s5252_s0 + $0x32c] sm:$0xf0]  ;;  %v2504_v23 = vor.u32 %v3291_v13, %v2503_v12  ;;  %1597 = vmatpush.bf16.msra.mxu0 %v2248_v18 }
  0x1d   :  { %v2231_v16 = vld [vmem:[%s5252_s0] sm:$0xf]  ;;  %v3223_v17 = vld [vmem:[%s5252_s0 + $0xc] sm:$0xf0]  ;;  %v2632_v27 = vor.u32 %v3323_v15, %v2631_v14  ;;  %1615 = vmatpush.bf16.msra.mxu1 %v2376_v22  ;;  %v272_v15 = vld [vmem:[%s5254_s2 + $0x8] sm:$0xff] }
  0x1e   :  { %v2359_v19 = vld [vmem:[%s5252_s0 + $0x100] sm:$0xf]  ;;  %v3255_v20 = vld [vmem:[%s5252_s0 + $0x10c] sm:$0xf0]  ;;  %v2232_v36 = vor.u32 %v3223_v17, %v2231_v16  ;;  %1633 = vmatpush.bf16.msra.mxu2 %v2504_v23 }
  0x1f   :  { %v2487_v21 = vld [vmem:[%s5252_s0 + $0x200] sm:$0xf]  ;;  %v3287_v24 = vld [vmem:[%s5252_s0 + $0x20c] sm:$0xf0]  ;;  %v2360_v41 = vor.u32 %v3255_v20, %v2359_v19  ;;  %1651 = vmatpush.bf16.msra.mxu3 %v2632_v27 }
  0x20   :  { %v2615_v25 = vld [vmem:[%s5252_s0 + $0x300] sm:$0xf]  ;;  %v3319_v26 = vld [vmem:[%s5252_s0 + $0x30c] sm:$0xf0]  ;;  %v2488_v42 = vor.u32 %v3287_v24, %v2487_v21  ;;  %1598 = vmatpush.bf16.msra.mxu0 %v2232_v36  ;;  %v24_v24 = vld [vmem:[%s5253_s1 + $0x48] sm:$0x33] }
  0x21   :  { %v2199_v28 = vld [vmem:[%s5253_s1] sm:$0xf]  ;;  %v3443_v31 = vld [vmem:[%s5252_s0 + $0x6ec] sm:$0xf0]  ;;  %v2616_v46 = vor.u32 %v3319_v26, %v2615_v25  ;;  %1616 = vmatpush.bf16.msra.mxu1 %v2360_v41  ;;  %v319_v36 = vunpack.c.l.b16 %v24_v24  ;;  %v320_v41 = vunpack.c.h.b16 %v24_v24  ;;  %v3281_v24 = vld [vmem:[%s5252_s0 + $0x1e4] sm:$0xf] }
  0x22   :  { %v3217_v29 = vld [vmem:[%s5253_s1 + $0x1c] sm:$0xf0]  ;;  %v3463_v35 = vld [vmem:[%s5252_s0 + $0x78c] sm:$0x30]  ;;  %1634 = vmatpush.bf16.msra.mxu2 %v2488_v42 }
  0x23   :  { %v3111_v30 = vld [vmem:[%s5252_s0 + $0x6e0] sm:$0xf]  ;;  %v3411_v39 = vld [vmem:[%s5252_s0 + $0x5ec] sm:$0xf0]  ;;  %v3756_v52 = vor.u32 %v3217_v29, %v2199_v28  ;;  %1652 = vmatpush.bf16.msra.mxu3 %v2616_v46 }
  0x24   :  { %v3191_v34 = vld [vmem:[%s5252_s0 + $0x780] sm:$0xf]  ;;  %v3112_v47 = vor.u32 %v3443_v31, %v3111_v30  ;;  %v3379_v49 = vld [vmem:[%s5252_s0 + $0x4ec] sm:$0xf0]  ;;  %1617 = vmatmul.bf16.vlgmr.msra.gmra.mxu1 %v3764_v56 }
  0x25   :  { %v2983_v38 = vld [vmem:[%s5252_s0 + $0x5e0] sm:$0xf]  ;;  %v3192_v50 = vor.u32 %v3463_v35, %v3191_v34  ;;  %v3439_v55 = vld [vmem:[%s5252_s0 + $0x6cc] sm:$0xf0]  ;;  %1599 = vmatmul.bf16.vlgmr.msra.gmra.mxu0 %v3756_v52  ;;  %1635 = vmatmul.bf16.vlgmr.msra.gmra.mxu2 %v3766_v57 }
  0x26   :  { %v2855_v48 = vld [vmem:[%s5252_s0 + $0x4e0] sm:$0xf]  ;;  %v2984_v53 = vor.u32 %v3411_v39, %v2983_v38  ;;  %v3407_v59 = vld [vmem:[%s5252_s0 + $0x5cc] sm:$0xf0]  ;;  %1699 = vmatpush.bf16.msrb.mxu2 %v3112_v47  ;;  %1653 = vmatmul.bf16.vlgmr.msra.gmra.mxu3 %v3774_v60 }
  0x27   :  { %v271_v51 = vld [vmem:[%s5254_s2] sm:$0xff]  ;;  %v2856_v61 = vor.u32 %v3379_v49, %v2855_v48  ;;  %v1580_v63 = vsel %vm1578_vm0, %v3192_v50, 0  ;;  %v3375_v1 = vld [vmem:[%s5252_s0 + $0x4cc] sm:$0xf0] }
  0x28   :  { %v3095_v54 = vld [vmem:[%s5252_s0 + $0x6c0] sm:$0xf]  ;;  %276 = vperm.xlu0 %3466, %v271_v51   ;;  %1681 = vmatpush.bf16.msrb.mxu1 %v2984_v53  ;;  %v3435_v4 = vld [vmem:[%s5252_s0 + $0x6ac] sm:$0xf0] }
  0x29   :  { %v2967_v58 = vld [vmem:[%s5252_s0 + $0x5c0] sm:$0xf]  ;;  %v3096_v0 = vor.u32 %v3439_v55, %v3095_v54  ;;  %v3459_v6 = vld [vmem:[%s5252_s0 + $0x76c] sm:$0xf0]  ;;  %1663 = vmatpush.bf16.msrb.mxu0 %v2856_v61  ;;  %1720 = vmatpush.bf16.msrb.mxu3 %v1580_v63  ;;  %v3887_v54 = vpack.c.b16 %v319_v36, %v319_v36 }
  0x2a   :  { %v2839_v62 = vld [vmem:[%s5252_s0 + $0x4c0] sm:$0xf]  ;;  %v2968_v3 = vor.u32 %v3407_v59, %v2967_v58  ;;  %v3403_v8 = vld [vmem:[%s5252_s0 + $0x5ac] sm:$0xf0]  ;;  %v3895_v59 = vpack.c.b16 %v320_v41, %v320_v41  ;;  %v3309_v41 = vld [vmem:[%s5252_s0 + $0x2c4] sm:$0xf] }
  0x2b   :  { %v3079_v2 = vld [vmem:[%s5252_s0 + $0x6a0] sm:$0xf]  ;;  %v2840_v9 = vor.u32 %v3375_v1, %v2839_v62  ;;  %1700 = vmatpush.bf16.msrb.mxu2 %v3096_v0  ;;  %v3371_v12 = vld [vmem:[%s5252_s0 + $0x4ac] sm:$0xf0] }
  0x2c   :  { %v3175_v5 = vld [vmem:[%s5252_s0 + $0x760] sm:$0xf]  ;;  %v3080_v11 = vor.u32 %v3435_v4, %v3079_v2  ;;  %1682 = vmatpush.bf16.msrb.mxu1 %v2968_v3  ;;  %v3431_v17 = vld [vmem:[%s5252_s0 + $0x68c] sm:$0xf0] }
  0x2d   :  { %v2951_v7 = vld [vmem:[%s5252_s0 + $0x5a0] sm:$0xf]  ;;  %v3176_v13 = vor.u32 %v3459_v6, %v3175_v5  ;;  %v3455_v19 = vld [vmem:[%s5252_s0 + $0x74c] sm:$0xf0]  ;;  %1664 = vmatpush.bf16.msrb.mxu0 %v2840_v9  ;;  %v3345_v5 = vld [vmem:[%s5252_s0 + $0x3e4] sm:$0xf] }
  0x2e   :  { %v2823_v10 = vld [vmem:[%s5252_s0 + $0x4a0] sm:$0xf]  ;;  %v2952_v16 = vor.u32 %v3403_v8, %v2951_v7  ;;  %v3399_v21 = vld [vmem:[%s5252_s0 + $0x58c] sm:$0xf0]  ;;  %v2729_v6 = vld [vmem:[%s5252_s0 + $0x3f0] sm:$0xf0] }
  0x2f   :  { %v3063_v14 = vld [vmem:[%s5252_s0 + $0x680] sm:$0xf]  ;;  %v2824_v23 = vor.u32 %v3371_v12, %v2823_v10  ;;  %1701 = vmatpush.bf16.msrb.mxu2 %v3080_v11  ;;  %1721 = vmatpush.bf16.msrb.mxu3 %v3176_v13  ;;  %v3367_v27 = vld [vmem:[%s5252_s0 + $0x48c] sm:$0xf0]  ;;  %v2732_v9 = vor.u32 %v3345_v5, %v2729_v6  ;;  %v3341_v12 = vld [vmem:[%s5252_s0 + $0x3c4] sm:$0xf] }
  0x30   :  { %v3159_v18 = vld [vmem:[%s5252_s0 + $0x740] sm:$0xf]  ;;  %281 = vperm.xlu0 %3466, %v272_v15   ;;  %v3064_v25 = vor.u32 %v3431_v17, %v3063_v14  ;;  %1683 = vmatpush.bf16.msrb.mxu1 %v2952_v16  ;;  %v3427_v32 = vld [vmem:[%s5252_s0 + $0x66c] sm:$0xf0]  ;;  %v2713_v16 = vld [vmem:[%s5252_s0 + $0x3d0] sm:$0xf0] }
  0x31   :  { %v2935_v20 = vld [vmem:[%s5252_s0 + $0x580] sm:$0xf]  ;;  %v3160_v28 = vor.u32 %v3455_v19, %v3159_v18  ;;  %v3451_v34 = vld [vmem:[%s5252_s0 + $0x72c] sm:$0xf0]  ;;  %1665 = vmatpush.bf16.msrb.mxu0 %v2824_v23  ;;  %v2601_v23 = vld [vmem:[%s5252_s0 + $0x2f0] sm:$0xf0] }
  0x32   :  { %v23_v22 = vld [vmem:[%s5253_s1 + $0x40] sm:$0x33]  ;;  %v2936_v30 = vor.u32 %v3399_v21, %v2935_v20  ;;  %v3395_v38 = vld [vmem:[%s5252_s0 + $0x56c] sm:$0xf0]  ;;  %v2716_v21 = vor.u32 %v3341_v12, %v2713_v16  ;;  %v2553_v16 = vld [vmem:[%s5252_s0 + $0x290] sm:$0xf0] }
  0x33   :  { %v2807_v26 = vld [vmem:[%s5252_s0 + $0x480] sm:$0xf]  ;;  %v317_v31 = vunpack.c.l.b16 %v23_v22  ;;  %v318_v35 = vunpack.c.h.b16 %v23_v22  ;;  %v273_v39 = vld [vmem:[%s5254_s2 + $0x10] sm:$0xf]  ;;  %1702 = vmatpush.bf16.msrb.mxu2 %v3064_v25  ;;  %1722 = vmatpush.bf16.msrb.mxu3 %v3160_v28  ;;  %v3313_v22 = vld [vmem:[%s5252_s0 + $0x2e4] sm:$0xf] }
  0x34   :  { %v3047_v29 = vld [vmem:[%s5252_s0 + $0x660] sm:$0xf]  ;;  %v2808_v40 = vor.u32 %v3367_v27, %v2807_v26  ;;  %286 = vperm.xlu1 %3467, %v273_v39   ;;  %v3363_v44 = vld [vmem:[%s5252_s0 + $0x46c] sm:$0xf0]  ;;  %1684 = vmatpush.bf16.msrb.mxu1 %v2936_v30  ;;  %v2473_v26 = vld [vmem:[%s5252_s0 + $0x1f0] sm:$0xf0]  ;;  %v2604_v36 = vor.u32 %v3313_v22, %v2601_v23 }
  0x35   :  { %v3143_v33 = vld [vmem:[%s5252_s0 + $0x720] sm:$0xf]  ;;  %v3048_v42 = vor.u32 %v3427_v32, %v3047_v29  ;;  %v3874_v47 = vpack.c.b16 %v317_v31, %v317_v31  ;;  %v3423_v49 = vld [vmem:[%s5252_s0 + $0x64c] sm:$0xf0]  ;;  %v3885_v53 = vpack.c.b16 %v318_v35, %v318_v35  ;;  %1640 = vmatmul.bf16.gmra.mxu2 %v3887_v54  ;;  %v3337_v27 = vld [vmem:[%s5252_s0 + $0x3a4] sm:$0xf] }
  0x36   :  { %v2919_v37 = vld [vmem:[%s5252_s0 + $0x560] sm:$0xf]  ;;  %v3144_v46 = vor.u32 %v3451_v34, %v3143_v33  ;;  %v3447_v51 = vld [vmem:[%s5252_s0 + $0x70c] sm:$0xf0]  ;;  %1666 = vmatpush.bf16.msrb.mxu0 %v2808_v40  ;;  %1658 = vmatmul.bf16.gmra.mxu3 %v3895_v59  ;;  %v2697_v28 = vld [vmem:[%s5252_s0 + $0x3b0] sm:$0xf0]  ;;  %v2476_v40 = vor.u32 %v3281_v24, %v2473_v26 }
  0x37   :  { %v2791_v43 = vld [vmem:[%s5252_s0 + $0x460] sm:$0xf]  ;;  %v2920_v48 = vor.u32 %v3395_v38, %v2919_v37  ;;  %v3391_v58 = vld [vmem:[%s5252_s0 + $0x54c] sm:$0xf0]  ;;  %1703 = vmatpush.bf16.msrb.mxu2 %v3048_v42  ;;  %1604 = vmatmul.bf16.gmra.mxu0 %v3874_v47  ;;  %v3215_v35 = vld [vmem:[%s5253_s1 + $0x14] sm:$0xf] }
  0x38   :  { %v3031_v45 = vld [vmem:[%s5252_s0 + $0x640] sm:$0xf]  ;;  %v2792_v61 = vor.u32 %v3363_v44, %v2791_v43  ;;  %v3359_v0 = vld [vmem:[%s5252_s0 + $0x44c] sm:$0xf0]  ;;  %1723 = vmatpush.bf16.msrb.mxu3 %v3144_v46  ;;  %1622 = vmatmul.bf16.gmra.mxu1 %v3885_v53  ;;  %v3249_v37 = vld [vmem:[%s5252_s0 + $0xe4] sm:$0xf]  ;;  %v2700_v43 = vor.u32 %v3337_v27, %v2697_v28 }
  0x39   :  { %v3127_v50 = vld [vmem:[%s5252_s0 + $0x700] sm:$0xf]  ;;  %v3032_v62 = vor.u32 %v3423_v49, %v3031_v45  ;;  %1685 = vmatpush.bf16.msrb.mxu1 %v2920_v48  ;;  %v3419_v4 = vld [vmem:[%s5252_s0 + $0x62c] sm:$0xf0]  ;;  %v2345_v38 = vld [vmem:[%s5252_s0 + $0xf0] sm:$0xf0] }
  0x3a   :  { %v2903_v55 = vld [vmem:[%s5252_s0 + $0x540] sm:$0xf]  ;;  %v3128_v2 = vor.u32 %v3447_v51, %v3127_v50  ;;  %v3387_v8 = vld [vmem:[%s5252_s0 + $0x52c] sm:$0xf0]  ;;  %1667 = vmatpush.bf16.msrb.mxu0 %v2792_v61  ;;  %v2217_v39 = vld [vmem:[%s5253_s1 + $0x30] sm:$0xf0]  ;;  %v2348_v50 = vor.u32 %v3249_v37, %v2345_v38 }
  0x3b   :  { %v2775_v63 = vld [vmem:[%s5252_s0 + $0x440] sm:$0xf]  ;;  %v2904_v3 = vor.u32 %v3391_v58, %v2903_v55  ;;  %1704 = vmatpush.bf16.msrb.mxu2 %v3032_v62  ;;  %v3355_v14 = vld [vmem:[%s5252_s0 + $0x42c] sm:$0xf0]  ;;  %v2585_v42 = vld [vmem:[%s5252_s0 + $0x2d0] sm:$0xf0] }
  0x3c   :  { %v3015_v1 = vld [vmem:[%s5252_s0 + $0x620] sm:$0xf]  ;;  %v2776_v10 = vor.u32 %v3359_v0, %v2775_v63  ;;  %1724 = vmatpush.bf16.msrb.mxu3 %v3128_v2  ;;  %v3415_v18 = vld [vmem:[%s5252_s0 + $0x60c] sm:$0xf0]  ;;  %v2223_v45 = vld [vmem:[%s5253_s1 + $0x18] sm:$0xf]  ;;  %v2588_v58 = vor.u32 %v3309_v41, %v2585_v42 }
  0x3d   :  { %v2887_v7 = vld [vmem:[%s5252_s0 + $0x520] sm:$0xf]  ;;  %v3016_v13 = vor.u32 %v3419_v4, %v3015_v1  ;;  %1686 = vmatpush.bf16.msrb.mxu1 %v2904_v3  ;;  %v3383_v20 = vld [vmem:[%s5252_s0 + $0x50c] sm:$0xf0]  ;;  %v3220_v46 = vld [vmem:[%s5253_s1 + $0x34] sm:$0xf0]  ;;  %v4026_v1 = vor.u32 %v3215_v35, %v2217_v39 }
  0x3e   :  { %v2759_v11 = vld [vmem:[%s5252_s0 + $0x420] sm:$0xf]  ;;  %v2888_v17 = vor.u32 %v3387_v8, %v2887_v7  ;;  %1668 = vmatpush.bf16.msrb.mxu0 %v2776_v10  ;;  %v3351_v31 = vld [vmem:[%s5252_s0 + $0x40c] sm:$0xf0]  ;;  %v3216_v48 = vld [vmem:[%s5253_s1 + $0x1c] sm:$0xf]  ;;  %v4037_v5 = vor.u32 %v3220_v46, %v2223_v45 }
  0x3f   :  { %v2999_v15 = vld [vmem:[%s5252_s0 + $0x600] sm:$0xf]  ;;  %v2760_v25 = vor.u32 %v3355_v14, %v2759_v11  ;;  %1705 = vmatpush.bf16.msrb.mxu2 %v3016_v13  ;;  %v2215_v33 = vld [vmem:[%s5253_s1 + $0x10] sm:$0xf]  ;;  %v2225_v49 = vld [vmem:[%s5253_s1 + $0x38] sm:$0xf0] }
  0x40   :  { %v2871_v19 = vld [vmem:[%s5252_s0 + $0x500] sm:$0xf]  ;;  %1789 = vmatpush.bf16.msra.mxu3 %v2732_v9  ;;  %v3000_v29 = vor.u32 %v3415_v18, %v2999_v15  ;;  %v3219_v34 = vld [vmem:[%s5253_s1 + $0x2c] sm:$0xf0]  ;;  %v3245_v51 = vld [vmem:[%s5252_s0 + $0xc4] sm:$0xf]  ;;  %v4039_v6 = vor.u32 %v3216_v48, %v2225_v49 }
  0x41   :  { %v2743_v30 = vld [vmem:[%s5252_s0 + $0x400] sm:$0xf]  ;;  %1687 = vmatpush.bf16.msrb.mxu1 %v2888_v17  ;;  %v2872_v32 = vor.u32 %v3383_v20, %v2871_v19  ;;  %v2329_v55 = vld [vmem:[%s5252_s0 + $0xd0] sm:$0xf0]  ;;  %v3277_v61 = vld [vmem:[%s5252_s0 + $0x1c4] sm:$0xf]  ;;  %v4024_v0 = vor.u32 %v3219_v34, %v2215_v33 }
  0x42   :  { %1669 = vmatpush.bf16.msrb.mxu0 %v2760_v25  ;;  %v2744_v44 = vor.u32 %v3351_v31, %v2743_v30  ;;  %v2457_v62 = vld [vmem:[%s5252_s0 + $0x1d0] sm:$0xf0]  ;;  %v3305_v63 = vld [vmem:[%s5252_s0 + $0x2a4] sm:$0xf]  ;;  %v2332_v7 = vor.u32 %v3245_v51, %v2329_v55  ;;  %v26_v34 = vld [vmem:[%s5253_s1 + $0x58] sm:$0x33] }
  0x43   :  { %1706 = vmatpush.bf16.msrb.mxu2 %v3000_v29  ;;  %v2569_v2 = vld [vmem:[%s5252_s0 + $0x2b0] sm:$0xf0]  ;;  %v3333_v3 = vld [vmem:[%s5252_s0 + $0x384] sm:$0xf]  ;;  %v2460_v8 = vor.u32 %v3277_v61, %v2457_v62  ;;  %v323_v48 = vunpack.c.l.b16 %v26_v34  ;;  %v324_v49 = vunpack.c.h.b16 %v26_v34 }
  0x44   :  { %1790 = vmatpush.bf16.msra.mxu3 %v2716_v21  ;;  %v2681_v4 = vld [vmem:[%s5252_s0 + $0x390] sm:$0xf0]  ;;  %v3241_v9 = vld [vmem:[%s5252_s0 + $0xa4] sm:$0xf]  ;;  %v2572_v11 = vor.u32 %v3305_v63, %v2569_v2 }
  0x45   :  { %1688 = vmatpush.bf16.msrb.mxu1 %v2872_v32  ;;  %v2313_v10 = vld [vmem:[%s5252_s0 + $0xb0] sm:$0xf0]  ;;  %v3273_v12 = vld [vmem:[%s5252_s0 + $0x1a4] sm:$0xf]  ;;  %v2684_v15 = vor.u32 %v3333_v3, %v2681_v4 }
  0x46   :  { %1670 = vmatpush.bf16.msrb.mxu0 %v2744_v44  ;;  %v2441_v13 = vld [vmem:[%s5252_s0 + $0x1b0] sm:$0xf0]  ;;  %v3301_v14 = vld [vmem:[%s5252_s0 + $0x284] sm:$0xf]  ;;  %1707 = vmatmul.bf16.vlgmr.msrb.gmra.mxu2 %v4037_v5  ;;  %v2316_v19 = vor.u32 %v3241_v9, %v2313_v10 }
  0x47   :  { %1771 = vmatpush.bf16.msra.mxu2 %v2604_v36  ;;  %v3329_v17 = vld [vmem:[%s5252_s0 + $0x364] sm:$0xf]  ;;  %v2665_v18 = vld [vmem:[%s5252_s0 + $0x370] sm:$0xf0]  ;;  %3205 = vmatmul.msk.bf16.vlgmr.msrb.gmra.mxu3 %vm1571_vm1, %v4039_v6  ;;  %v2444_v20 = vor.u32 %v3273_v12, %v2441_v13  ;;  %v2556_v23 = vor.u32 %v3301_v14, %v2553_v16  ;;  %v4158_v13 = vpack.c.b16 %v323_v48, %v323_v48 }
  0x48   :  { %1791 = vmatpush.bf16.msra.mxu3 %v2700_v43  ;;  %1689 = vmatmul.bf16.vlgmr.msrb.gmra.mxu1 %v4026_v1  ;;  %v3237_v21 = vld [vmem:[%s5252_s0 + $0x84] sm:$0xf]  ;;  %v2297_v22 = vld [vmem:[%s5252_s0 + $0x90] sm:$0xf0]  ;;  %v2668_v27 = vor.u32 %v3329_v17, %v2665_v18  ;;  %v4160_v14 = vpack.c.b16 %v324_v49, %v324_v49 }
  0x49   :  { %1753 = vmatpush.bf16.msra.mxu1 %v2476_v40  ;;  %1671 = vmatmul.bf16.vlgmr.msrb.gmra.mxu0 %v4024_v0  ;;  %v3269_v24 = vld [vmem:[%s5252_s0 + $0x184] sm:$0xf]  ;;  %v2425_v25 = vld [vmem:[%s5252_s0 + $0x190] sm:$0xf0]  ;;  %v2300_v32 = vor.u32 %v3237_v21, %v2297_v22 }
  0x4a   :  { %1735 = vmatpush.bf16.msra.mxu0 %v2348_v50  ;;  %v3297_v26 = vld [vmem:[%s5252_s0 + $0x264] sm:$0xf]  ;;  %v2537_v28 = vld [vmem:[%s5252_s0 + $0x270] sm:$0xf0]  ;;  %v2428_v33 = vor.u32 %v3269_v24, %v2425_v25 }
  0x4b   :  { %1772 = vmatpush.bf16.msra.mxu2 %v2588_v58  ;;  %v3325_v29 = vld [vmem:[%s5252_s0 + $0x344] sm:$0xf]  ;;  %v2649_v30 = vld [vmem:[%s5252_s0 + $0x350] sm:$0xf0]  ;;  %v2540_v37 = vor.u32 %v3297_v26, %v2537_v28 }
  0x4c   :  { %1792 = vmatpush.bf16.msra.mxu3 %v2684_v15  ;;  %v25_v31 = vld [vmem:[%s5253_s1 + $0x50] sm:$0x33]  ;;  %v3233_v35 = vld [vmem:[%s5252_s0 + $0x64] sm:$0xf]  ;;  %v2652_v41 = vor.u32 %v3325_v29, %v2649_v30 }
  0x4d   :  { %1754 = vmatpush.bf16.msra.mxu1 %v2460_v8  ;;  %v2281_v36 = vld [vmem:[%s5252_s0 + $0x70] sm:$0xf0]  ;;  %v3265_v38 = vld [vmem:[%s5252_s0 + $0x164] sm:$0xf]  ;;  %v321_v42 = vunpack.c.l.b16 %v25_v31  ;;  %v322_v43 = vunpack.c.h.b16 %v25_v31 }
  0x4e   :  { %1736 = vmatpush.bf16.msra.mxu0 %v2332_v7  ;;  %v2409_v39 = vld [vmem:[%s5252_s0 + $0x170] sm:$0xf0]  ;;  %v3293_v40 = vld [vmem:[%s5252_s0 + $0x244] sm:$0xf]  ;;  %v2284_v51 = vor.u32 %v3233_v35, %v2281_v36 }
  0x4f   :  { %1773 = vmatpush.bf16.msra.mxu2 %v2572_v11  ;;  %v2521_v44 = vld [vmem:[%s5252_s0 + $0x250] sm:$0xf0]  ;;  %v3321_v45 = vld [vmem:[%s5252_s0 + $0x324] sm:$0xf]  ;;  %v2412_v55 = vor.u32 %v3265_v38, %v2409_v39  ;;  %v4145_v8 = vpack.c.b16 %v321_v42, %v321_v42  ;;  %v4147_v9 = vpack.c.b16 %v322_v43, %v322_v43 }
  0x50   :  { %1793 = vmatpush.bf16.msra.mxu3 %v2668_v27  ;;  %v2633_v46 = vld [vmem:[%s5252_s0 + $0x330] sm:$0xf0]  ;;  %v3229_v50 = vld [vmem:[%s5252_s0 + $0x44] sm:$0xf]  ;;  %v2524_v63 = vor.u32 %v3293_v40, %v2521_v44 }
  0x51   :  { %1755 = vmatpush.bf16.msra.mxu1 %v2444_v20  ;;  %v2265_v58 = vld [vmem:[%s5252_s0 + $0x50] sm:$0xf0]  ;;  %v3461_v61 = vld [vmem:[%s5252_s0 + $0x784] sm:$0xf]  ;;  %v2636_v7 = vor.u32 %v3321_v45, %v2633_v46 }
  0x52   :  { %1737 = vmatpush.bf16.msra.mxu0 %v2316_v19  ;;  %v3193_v62 = vld [vmem:[%s5252_s0 + $0x790] sm:$0x30]  ;;  %v3261_v2 = vld [vmem:[%s5252_s0 + $0x144] sm:$0xf]  ;;  %v2268_v16 = vor.u32 %v3229_v50, %v2265_v58 }
  0x53   :  { %1774 = vmatpush.bf16.msra.mxu2 %v2556_v23  ;;  %v2393_v3 = vld [vmem:[%s5252_s0 + $0x150] sm:$0xf0]  ;;  %v3289_v4 = vld [vmem:[%s5252_s0 + $0x224] sm:$0xf]  ;;  %v3196_v15 = vor.u32 %v3461_v61, %v3193_v62 }
  0x54   :  { %1794 = vmatpush.bf16.msra.mxu3 %v2652_v41  ;;  %v2505_v10 = vld [vmem:[%s5252_s0 + $0x230] sm:$0xf0]  ;;  %v3317_v11 = vld [vmem:[%s5252_s0 + $0x304] sm:$0xf]  ;;  %v2396_v17 = vor.u32 %v3261_v2, %v2393_v3 }
  0x55   :  { %1756 = vmatpush.bf16.msra.mxu1 %v2428_v33  ;;  %v2617_v12 = vld [vmem:[%s5252_s0 + $0x310] sm:$0xf0]  ;;  %v3225_v18 = vld [vmem:[%s5252_s0 + $0x24] sm:$0xf]  ;;  %v2508_v20 = vor.u32 %v3289_v4, %v2505_v10  ;;  %v1583_v28 = vsel %vm1578_vm0, %v3196_v15, 0 }
  0x56   :  { %1738 = vmatpush.bf16.msra.mxu0 %v2300_v32  ;;  %v2249_v19 = vld [vmem:[%s5252_s0 + $0x30] sm:$0xf0]  ;;  %v3257_v21 = vld [vmem:[%s5252_s0 + $0x124] sm:$0xf]  ;;  %v2620_v24 = vor.u32 %v3317_v11, %v2617_v12  ;;  %1712 = vmatmul.bf16.gmra.mxu2 %v4158_v13 }
  0x57   :  { %1775 = vmatpush.bf16.msra.mxu2 %v2540_v37  ;;  %v2377_v22 = vld [vmem:[%s5252_s0 + $0x130] sm:$0xf0]  ;;  %v3285_v23 = vld [vmem:[%s5252_s0 + $0x204] sm:$0xf]  ;;  %3206 = vmatmul.msk.bf16.gmra.mxu3 %vm1571_vm1, %v4160_v14  ;;  %v2252_v31 = vor.u32 %v3225_v18, %v2249_v19 }
  0x58   :  { %1795 = vmatpush.bf16.msra.mxu3 %v2636_v7  ;;  %1694 = vmatmul.bf16.gmra.mxu1 %v4147_v9  ;;  %v2489_v25 = vld [vmem:[%s5252_s0 + $0x210] sm:$0xf0]  ;;  %v3441_v26 = vld [vmem:[%s5252_s0 + $0x6e4] sm:$0xf]  ;;  %v2380_v32 = vor.u32 %v3257_v21, %v2377_v22 }
  0x59   :  { %1757 = vmatpush.bf16.msra.mxu1 %v2412_v55  ;;  %1676 = vmatmul.bf16.gmra.mxu0 %v4145_v8  ;;  %v3113_v27 = vld [vmem:[%s5252_s0 + $0x6f0] sm:$0xf0]  ;;  %v3457_v29 = vld [vmem:[%s5252_s0 + $0x764] sm:$0xf]  ;;  %v2492_v36 = vor.u32 %v3285_v23, %v2489_v25 }
  0x5a   :  { %1739 = vmatpush.bf16.msra.mxu0 %v2284_v51  ;;  %v3177_v30 = vld [vmem:[%s5252_s0 + $0x770] sm:$0xf0]  ;;  %v3221_v33 = vld [vmem:[%s5252_s0 + $0x4] sm:$0xf]  ;;  %v3116_v40 = vor.u32 %v3441_v26, %v3113_v27 }
  0x5b   :  { %1776 = vmatpush.bf16.msra.mxu2 %v2524_v63  ;;  %v2233_v34 = vld [vmem:[%s5252_s0 + $0x10] sm:$0xf0]  ;;  %v3253_v35 = vld [vmem:[%s5252_s0 + $0x104] sm:$0xf]  ;;  %v3180_v44 = vor.u32 %v3457_v29, %v3177_v30 }
  0x5c   :  { %v2361_v37 = vld [vmem:[%s5252_s0 + $0x110] sm:$0xf0]  ;;  %1796 = vmatpush.bf16.msra.mxu3 %v2620_v24  ;;  %v3377_v38 = vld [vmem:[%s5252_s0 + $0x4e4] sm:$0xf]  ;;  %v2236_v49 = vor.u32 %v3221_v33, %v2233_v34  ;;  %v3348_v33 = vld [vmem:[%s5252_s0 + $0x3f4] sm:$0xf0] }
  0x5d   :  { %1758 = vmatpush.bf16.msra.mxu1 %v2396_v17  ;;  %v2857_v39 = vld [vmem:[%s5252_s0 + $0x4f0] sm:$0xf0]  ;;  %v3409_v41 = vld [vmem:[%s5252_s0 + $0x5e4] sm:$0xf]  ;;  %v2364_v50 = vor.u32 %v3253_v35, %v2361_v37 }
  0x5e   :  { %1740 = vmatpush.bf16.msra.mxu0 %v2268_v16  ;;  %v2985_v42 = vld [vmem:[%s5252_s0 + $0x5f0] sm:$0xf0]  ;;  %v3437_v43 = vld [vmem:[%s5252_s0 + $0x6c4] sm:$0xf]  ;;  %v2860_v51 = vor.u32 %v3377_v38, %v2857_v39 }
  0x5f   :  { %1777 = vmatpush.bf16.msra.mxu2 %v2508_v20  ;;  %v3097_v45 = vld [vmem:[%s5252_s0 + $0x6d0] sm:$0xf0]  ;;  %v3453_v46 = vld [vmem:[%s5252_s0 + $0x744] sm:$0xf]  ;;  %v2988_v55 = vor.u32 %v3409_v41, %v2985_v42 }
  0x60   :  { %1864 = vmatpush.bf16.msrb.mxu3 %v1583_v28  ;;  %v3161_v48 = vld [vmem:[%s5252_s0 + $0x750] sm:$0xf0]  ;;  %v3373_v58 = vld [vmem:[%s5252_s0 + $0x4c4] sm:$0xf]  ;;  %v3100_v61 = vor.u32 %v3437_v43, %v3097_v45  ;;  %v2719_v45 = vld [vmem:[%s5252_s0 + $0x3c8] sm:$0xf] }
  0x61   :  { %1759 = vmatpush.bf16.msra.mxu1 %v2380_v32  ;;  %v2841_v62 = vld [vmem:[%s5252_s0 + $0x4d0] sm:$0xf0]  ;;  %v3405_v63 = vld [vmem:[%s5252_s0 + $0x5c4] sm:$0xf]  ;;  %v3164_v3 = vor.u32 %v3453_v46, %v3161_v48  ;;  %v2735_v32 = vld [vmem:[%s5252_s0 + $0x3e8] sm:$0xf] }
  0x62   :  { %1741 = vmatpush.bf16.msra.mxu0 %v2252_v31  ;;  %v2969_v2 = vld [vmem:[%s5252_s0 + $0x5d0] sm:$0xf0]  ;;  %v3433_v4 = vld [vmem:[%s5252_s0 + $0x6a4] sm:$0xf]  ;;  %v2844_v10 = vor.u32 %v3373_v58, %v2841_v62  ;;  %v3344_v46 = vld [vmem:[%s5252_s0 + $0x3d4] sm:$0xf0] }
  0x63   :  { %1778 = vmatpush.bf16.msra.mxu2 %v2492_v36  ;;  %v3081_v7 = vld [vmem:[%s5252_s0 + $0x6b0] sm:$0xf0]  ;;  %v2972_v11 = vor.u32 %v3405_v63, %v2969_v2  ;;  %v3369_v12 = vld [vmem:[%s5252_s0 + $0x4a4] sm:$0xf]  ;;  %v2720_v2 = vor.u32 %v3344_v46, %v2719_v45  ;;  %v2591_v46 = vld [vmem:[%s5252_s0 + $0x2c8] sm:$0xf] }
  0x64   :  { %1865 = vmatpush.bf16.msrb.mxu3 %v3180_v44  ;;  %v3449_v15 = vld [vmem:[%s5252_s0 + $0x724] sm:$0xf]  ;;  %v3145_v16 = vld [vmem:[%s5252_s0 + $0x730] sm:$0xf0]  ;;  %v3084_v20 = vor.u32 %v3433_v4, %v3081_v7  ;;  %v2736_v44 = vor.u32 %v3348_v33, %v2735_v32  ;;  %v2607_v32 = vld [vmem:[%s5252_s0 + $0x2e8] sm:$0xf] }
  0x65   :  { %1760 = vmatpush.bf16.msra.mxu1 %v2364_v50  ;;  %v2825_v17 = vld [vmem:[%s5252_s0 + $0x4b0] sm:$0xf0]  ;;  %v3401_v18 = vld [vmem:[%s5252_s0 + $0x5a4] sm:$0xf]  ;;  %v3148_v23 = vor.u32 %v3449_v15, %v3145_v16  ;;  %v2703_v15 = vld [vmem:[%s5252_s0 + $0x3a8] sm:$0xf] }
  0x66   :  { %1742 = vmatpush.bf16.msra.mxu0 %v2236_v49  ;;  %v2953_v19 = vld [vmem:[%s5252_s0 + $0x5b0] sm:$0xf0]  ;;  %v3429_v21 = vld [vmem:[%s5252_s0 + $0x684] sm:$0xf]  ;;  %v2828_v24 = vor.u32 %v3369_v12, %v2825_v17  ;;  %1779 = vmatmul.bf16.vlgmr.msra.gmra.mxu2 %v3766_v57  ;;  %v3340_v16 = vld [vmem:[%s5252_s0 + $0x3b4] sm:$0xf0] }
  0x67   :  { %1843 = vmatpush.bf16.msrb.mxu2 %v3116_v40  ;;  %v3065_v22 = vld [vmem:[%s5252_s0 + $0x690] sm:$0xf0]  ;;  %v2956_v25 = vor.u32 %v3401_v18, %v2953_v19  ;;  %v3365_v26 = vld [vmem:[%s5252_s0 + $0x484] sm:$0xf]  ;;  %1797 = vmatmul.bf16.vlgmr.msra.gmra.mxu3 %v3774_v60  ;;  %v3316_v33 = vld [vmem:[%s5252_s0 + $0x2f4] sm:$0xf0] }
  0x68   :  { %1866 = vmatpush.bf16.msrb.mxu3 %v3164_v3  ;;  %v3445_v27 = vld [vmem:[%s5252_s0 + $0x704] sm:$0xf]  ;;  %v3129_v28 = vld [vmem:[%s5252_s0 + $0x710] sm:$0xf0]  ;;  %1761 = vmatmul.bf16.vlgmr.msra.gmra.mxu1 %v3764_v56  ;;  %v3068_v34 = vor.u32 %v3429_v21, %v3065_v22 }
  0x69   :  { %1825 = vmatpush.bf16.msrb.mxu1 %v2988_v55  ;;  %1743 = vmatmul.bf16.vlgmr.msra.gmra.mxu0 %v3756_v52  ;;  %v2809_v29 = vld [vmem:[%s5252_s0 + $0x490] sm:$0xf0]  ;;  %v3397_v30 = vld [vmem:[%s5252_s0 + $0x584] sm:$0xf]  ;;  %v3132_v35 = vor.u32 %v3445_v27, %v3129_v28  ;;  %v2687_v28 = vld [vmem:[%s5252_s0 + $0x388] sm:$0xf] }
  0x6a   :  { %1807 = vmatpush.bf16.msrb.mxu0 %v2860_v51  ;;  %v2937_v31 = vld [vmem:[%s5252_s0 + $0x590] sm:$0xf0]  ;;  %v2812_v36 = vor.u32 %v3365_v26, %v2809_v29  ;;  %v3425_v38 = vld [vmem:[%s5252_s0 + $0x664] sm:$0xf]  ;;  %v3336_v29 = vld [vmem:[%s5252_s0 + $0x394] sm:$0xf0] }
  0x6b   :  { %1844 = vmatpush.bf16.msrb.mxu2 %v3100_v61  ;;  %v2940_v37 = vor.u32 %v3397_v30, %v2937_v31  ;;  %v3049_v39 = vld [vmem:[%s5252_s0 + $0x670] sm:$0xf0]  ;;  %v3361_v40 = vld [vmem:[%s5252_s0 + $0x464] sm:$0xf] }
  0x6c   :  { %1867 = vmatpush.bf16.msrb.mxu3 %v3148_v23  ;;  %v2793_v41 = vld [vmem:[%s5252_s0 + $0x470] sm:$0xf0]  ;;  %v3393_v42 = vld [vmem:[%s5252_s0 + $0x564] sm:$0xf]  ;;  %v3052_v48 = vor.u32 %v3425_v38, %v3049_v39  ;;  %v3284_v38 = vld [vmem:[%s5252_s0 + $0x1f4] sm:$0xf0]  ;;  %v2688_v39 = vor.u32 %v3336_v29, %v2687_v28 }
  0x6d   :  { %1826 = vmatpush.bf16.msrb.mxu1 %v2972_v11  ;;  %v2921_v43 = vld [vmem:[%s5252_s0 + $0x570] sm:$0xf0]  ;;  %v2796_v49 = vor.u32 %v3361_v40, %v2793_v41  ;;  %v3421_v51 = vld [vmem:[%s5252_s0 + $0x644] sm:$0xf]  ;;  %v3272_v29 = vld [vmem:[%s5252_s0 + $0x194] sm:$0xf0] }
  0x6e   :  { %1808 = vmatpush.bf16.msrb.mxu0 %v2844_v10  ;;  %v2924_v50 = vor.u32 %v3393_v42, %v2921_v43  ;;  %v3033_v55 = vld [vmem:[%s5252_s0 + $0x650] sm:$0xf0]  ;;  %v3357_v58 = vld [vmem:[%s5252_s0 + $0x444] sm:$0xf]  ;;  %v2671_v42 = vld [vmem:[%s5252_s0 + $0x368] sm:$0xf] }
  0x6f   :  { %1845 = vmatpush.bf16.msrb.mxu2 %v3084_v20  ;;  %v2777_v61 = vld [vmem:[%s5252_s0 + $0x450] sm:$0xf0]  ;;  %v3389_v62 = vld [vmem:[%s5252_s0 + $0x544] sm:$0xf]  ;;  %v3036_v3 = vor.u32 %v3421_v51, %v3033_v55  ;;  %v3332_v43 = vld [vmem:[%s5252_s0 + $0x374] sm:$0xf0] }
  0x70   :  { %1868 = vmatpush.bf16.msrb.mxu3 %v3132_v35  ;;  %v2905_v63 = vld [vmem:[%s5252_s0 + $0x550] sm:$0xf0]  ;;  %v3417_v4 = vld [vmem:[%s5252_s0 + $0x624] sm:$0xf]  ;;  %v2780_v10 = vor.u32 %v3357_v58, %v2777_v61  ;;  %v3252_v35 = vld [vmem:[%s5252_s0 + $0xf4] sm:$0xf0]  ;;  %v2672_v61 = vor.u32 %v3332_v43, %v2671_v42 }
  0x71   :  { %1827 = vmatpush.bf16.msrb.mxu1 %v2956_v25  ;;  %v3017_v7 = vld [vmem:[%s5252_s0 + $0x630] sm:$0xf0]  ;;  %v2908_v11 = vor.u32 %v3389_v62, %v2905_v63  ;;  %v3353_v12 = vld [vmem:[%s5252_s0 + $0x424] sm:$0xf]  ;;  %v3248_v51 = vld [vmem:[%s5252_s0 + $0xd4] sm:$0xf0] }
  0x72   :  { %1809 = vmatpush.bf16.msrb.mxu0 %v2828_v24  ;;  %v2761_v17 = vld [vmem:[%s5252_s0 + $0x430] sm:$0xf0]  ;;  %v3385_v18 = vld [vmem:[%s5252_s0 + $0x524] sm:$0xf]  ;;  %v3020_v20 = vor.u32 %v3417_v4, %v3017_v7  ;;  %v2704_v24 = vor.u32 %v3340_v16, %v2703_v15  ;;  %v2463_v55 = vld [vmem:[%s5252_s0 + $0x1c8] sm:$0xf] }
  0x73   :  { %1846 = vmatpush.bf16.msrb.mxu2 %v3068_v34  ;;  %v2889_v19 = vld [vmem:[%s5252_s0 + $0x530] sm:$0xf0]  ;;  %v3413_v21 = vld [vmem:[%s5252_s0 + $0x604] sm:$0xf]  ;;  %v2764_v25 = vor.u32 %v3353_v12, %v2761_v17  ;;  %v2351_v34 = vld [vmem:[%s5252_s0 + $0xe8] sm:$0xf] }
  0x74   :  { %1933 = vmatpush.bf16.msra.mxu3 %v2736_v44  ;;  %v3001_v22 = vld [vmem:[%s5252_s0 + $0x610] sm:$0xf0]  ;;  %v3349_v23 = vld [vmem:[%s5252_s0 + $0x404] sm:$0xf]  ;;  %v2892_v26 = vor.u32 %v3385_v18, %v2889_v19  ;;  %v2608_v44 = vor.u32 %v3316_v33, %v2607_v32  ;;  %v2352_v45 = vor.u32 %v3252_v35, %v2351_v34  ;;  %v3280_v58 = vld [vmem:[%s5252_s0 + $0x1d4] sm:$0xf0] }
  0x75   :  { %1828 = vmatpush.bf16.msrb.mxu1 %v2940_v37  ;;  %v2745_v27 = vld [vmem:[%s5252_s0 + $0x410] sm:$0xf0]  ;;  %v3381_v30 = vld [vmem:[%s5252_s0 + $0x504] sm:$0xf]  ;;  %v2479_v37 = vld [vmem:[%s5252_s0 + $0x1e8] sm:$0xf]  ;;  %v2464_v4 = vor.u32 %v3280_v58, %v2463_v55 }
  0x76   :  { %1810 = vmatpush.bf16.msrb.mxu0 %v2812_v36  ;;  %v2873_v31 = vld [vmem:[%s5252_s0 + $0x510] sm:$0xf0]  ;;  %1784 = vmatmul.bf16.gmra.mxu2 %v3887_v54  ;;  %v3004_v36 = vor.u32 %v3413_v21, %v3001_v22  ;;  %v2748_v40 = vor.u32 %v3349_v23, %v2745_v27  ;;  %v2655_v62 = vld [vmem:[%s5252_s0 + $0x348] sm:$0xf]  ;;  %v3328_v63 = vld [vmem:[%s5252_s0 + $0x354] sm:$0xf0] }
  0x77   :  { %1847 = vmatpush.bf16.msrb.mxu2 %v3052_v48  ;;  %1802 = vmatmul.bf16.gmra.mxu3 %v3895_v59  ;;  %v2876_v41 = vor.u32 %v3381_v30, %v2873_v31  ;;  %v2480_v48 = vor.u32 %v3284_v38, %v2479_v37  ;;  %v2575_v7 = vld [vmem:[%s5252_s0 + $0x2a8] sm:$0xf]  ;;  %v3244_v15 = vld [vmem:[%s5252_s0 + $0xb4] sm:$0xf0] }
  0x78   :  { %1934 = vmatpush.bf16.msra.mxu3 %v2720_v2  ;;  %1766 = vmatmul.bf16.gmra.mxu1 %v3885_v53  ;;  %v2319_v12 = vld [vmem:[%s5252_s0 + $0xa8] sm:$0xf]  ;;  %v3276_v17 = vld [vmem:[%s5252_s0 + $0x1b4] sm:$0xf0] }
  0x79   :  { %1829 = vmatpush.bf16.msrb.mxu1 %v2924_v50  ;;  %1748 = vmatmul.bf16.gmra.mxu0 %v3874_v47  ;;  %v2335_v50 = vld [vmem:[%s5252_s0 + $0xc8] sm:$0xf]  ;;  %v3324_v19 = vld [vmem:[%s5252_s0 + $0x334] sm:$0xf0]  ;;  %v2320_v21 = vor.u32 %v3244_v15, %v2319_v12 }
  0x7a   :  { %1811 = vmatpush.bf16.msrb.mxu0 %v2796_v49  ;;  %v3312_v49 = vld [vmem:[%s5252_s0 + $0x2d4] sm:$0xf0]  ;;  %v2447_v16 = vld [vmem:[%s5252_s0 + $0x1a8] sm:$0xf] }
  0x7b   :  { %1848 = vmatpush.bf16.msrb.mxu2 %v3036_v3  ;;  %v2592_v2 = vor.u32 %v3312_v49, %v2591_v46  ;;  %v2336_v3 = vor.u32 %v3248_v51, %v2335_v50  ;;  %v2639_v18 = vld [vmem:[%s5252_s0 + $0x328] sm:$0xf]  ;;  %v3304_v23 = vld [vmem:[%s5252_s0 + $0x294] sm:$0xf0] }
  0x7c   :  { %1935 = vmatpush.bf16.msra.mxu3 %v2704_v24  ;;  %v2559_v22 = vld [vmem:[%s5252_s0 + $0x288] sm:$0xf]  ;;  %v2448_v24 = vor.u32 %v3276_v17, %v2447_v16  ;;  %v2640_v28 = vor.u32 %v3324_v19, %v2639_v18  ;;  %v3320_v31 = vld [vmem:[%s5252_s0 + $0x314] sm:$0xf0] }
  0x7d   :  { %1830 = vmatpush.bf16.msrb.mxu1 %v2908_v11  ;;  %v2656_v11 = vor.u32 %v3328_v63, %v2655_v62  ;;  %v2431_v27 = vld [vmem:[%s5252_s0 + $0x188] sm:$0xf]  ;;  %v3464_v33 = vld [vmem:[%s5252_s0 + $0x794] sm:$0x30]  ;;  %v2560_v34 = vor.u32 %v3304_v23, %v2559_v22 }
  0x7e   :  { %1812 = vmatpush.bf16.msrb.mxu0 %v2780_v10  ;;  %v3308_v10 = vld [vmem:[%s5252_s0 + $0x2b4] sm:$0xf0]  ;;  %v2623_v30 = vld [vmem:[%s5252_s0 + $0x308] sm:$0xf]  ;;  %v2432_v38 = vor.u32 %v3272_v29, %v2431_v27 }
  0x7f   :  { %1849 = vmatpush.bf16.msrb.mxu2 %v3020_v20  ;;  %v2576_v20 = vor.u32 %v3308_v10, %v2575_v7  ;;  %v3199_v32 = vld [vmem:[%s5252_s0 + $0x788] sm:$0xf]  ;;  %v2624_v42 = vor.u32 %v3320_v31, %v2623_v30  ;;  %v3296_v51 = vld [vmem:[%s5252_s0 + $0x254] sm:$0xf0] }
  0x80   :  { %1936 = vmatpush.bf16.msra.mxu3 %v2688_v39  ;;  %v3200_v37 = vor.u32 %v3464_v33, %v3199_v32  ;;  %v3300_v39 = vld [vmem:[%s5252_s0 + $0x274] sm:$0xf0]  ;;  %v2415_v43 = vld [vmem:[%s5252_s0 + $0x168] sm:$0xf] }
  0x81   :  { %1831 = vmatpush.bf16.msrb.mxu1 %v2892_v26  ;;  %v3240_v26 = vld [vmem:[%s5252_s0 + $0x94] sm:$0xf0]  ;;  %v2527_v49 = vld [vmem:[%s5252_s0 + $0x248] sm:$0xf] }
  0x82   :  { %1813 = vmatpush.bf16.msrb.mxu0 %v2764_v25  ;;  %v2303_v25 = vld [vmem:[%s5252_s0 + $0x88] sm:$0xf]  ;;  %v3232_v58 = vld [vmem:[%s5252_s0 + $0x54] sm:$0xf0] }
  0x83   :  { %1850 = vmatpush.bf16.msrb.mxu2 %v3004_v36  ;;  %v2304_v35 = vor.u32 %v3240_v26, %v2303_v25  ;;  %v2543_v36 = vld [vmem:[%s5252_s0 + $0x268] sm:$0xf]  ;;  %v3264_v62 = vld [vmem:[%s5252_s0 + $0x154] sm:$0xf0] }
  0x84   :  { %1937 = vmatpush.bf16.msra.mxu3 %v2672_v61  ;;  %v2544_v46 = vor.u32 %v3300_v39, %v2543_v36  ;;  %v2271_v55 = vld [vmem:[%s5252_s0 + $0x48] sm:$0xf]  ;;  %v3292_v12 = vld [vmem:[%s5252_s0 + $0x234] sm:$0xf0] }
  0x85   :  { %1832 = vmatpush.bf16.msrb.mxu1 %v2876_v41  ;;  %v3236_v41 = vld [vmem:[%s5252_s0 + $0x74] sm:$0xf0]  ;;  %v2399_v61 = vld [vmem:[%s5252_s0 + $0x148] sm:$0xf] }
  0x86   :  { %1814 = vmatpush.bf16.msrb.mxu0 %v2748_v40  ;;  %1851 = vmatmul.bf16.vlgmr.msrb.gmra.mxu2 %v4037_v5  ;;  %v2287_v40 = vld [vmem:[%s5252_s0 + $0x68] sm:$0xf]  ;;  %v3228_v16 = vld [vmem:[%s5252_s0 + $0x34] sm:$0xf0] }
  0x87   :  { %1915 = vmatpush.bf16.msra.mxu2 %v2608_v44  ;;  %3207 = vmatmul.msk.bf16.vlgmr.msrb.gmra.mxu3 %vm1571_vm1, %v4039_v6  ;;  %v3268_v44 = vld [vmem:[%s5252_s0 + $0x174] sm:$0xf0]  ;;  %v3183_v63 = vld [vmem:[%s5252_s0 + $0x768] sm:$0xf] }
  0x88   :  { %1938 = vmatpush.bf16.msra.mxu3 %v2656_v11  ;;  %1833 = vmatmul.bf16.vlgmr.msrb.gmra.mxu1 %v4026_v1  ;;  %v2416_v50 = vor.u32 %v3268_v44, %v2415_v43  ;;  %v2511_v7 = vld [vmem:[%s5252_s0 + $0x228] sm:$0xf]  ;;  %v2400_v11 = vor.u32 %v3264_v62, %v2399_v61  ;;  %v3260_v18 = vld [vmem:[%s5252_s0 + $0x134] sm:$0xf0] }
  0x89   :  { %1897 = vmatpush.bf16.msra.mxu1 %v2480_v48  ;;  %1815 = vmatmul.bf16.vlgmr.msrb.gmra.mxu0 %v4024_v0  ;;  %v2288_v48 = vor.u32 %v3236_v41, %v2287_v40  ;;  %v2255_v15 = vld [vmem:[%s5252_s0 + $0x28] sm:$0xf]  ;;  %v3456_v25 = vld [vmem:[%s5252_s0 + $0x754] sm:$0xf0] }
  0x8a   :  { %1879 = vmatpush.bf16.msra.mxu0 %v2352_v45  ;;  %v1586_v45 = vsel %vm1578_vm0, %v3200_v37, 0  ;;  %v2383_v17 = vld [vmem:[%s5252_s0 + $0x128] sm:$0xf]  ;;  %v2256_v22 = vor.u32 %v3228_v16, %v2255_v15  ;;  %v3224_v27 = vld [vmem:[%s5252_s0 + $0x14] sm:$0xf0] }
  0x8b   :  { %1916 = vmatpush.bf16.msra.mxu2 %v2592_v2  ;;  %v3460_v2 = vld [vmem:[%s5252_s0 + $0x774] sm:$0xf0]  ;;  %v2495_v19 = vld [vmem:[%s5252_s0 + $0x208] sm:$0xf]  ;;  %v2384_v26 = vor.u32 %v3260_v18, %v2383_v17 }
  0x8c   :  { %1939 = vmatpush.bf16.msra.mxu3 %v2640_v28  ;;  %v3184_v10 = vor.u32 %v3460_v2, %v3183_v63  ;;  %v2239_v23 = vld [vmem:[%s5252_s0 + $0x8] sm:$0xf]  ;;  %v3256_v29 = vld [vmem:[%s5252_s0 + $0x114] sm:$0xf0] }
  0x8d   :  { %1898 = vmatpush.bf16.msra.mxu1 %v2464_v4  ;;  %v2272_v4 = vor.u32 %v3232_v58, %v2271_v55  ;;  %v2367_v28 = vld [vmem:[%s5252_s0 + $0x108] sm:$0xf]  ;;  %v3444_v32 = vld [vmem:[%s5252_s0 + $0x6f4] sm:$0xf0] }
  0x8e   :  { %1880 = vmatpush.bf16.msra.mxu0 %v2336_v3  ;;  %v2528_v3 = vor.u32 %v3296_v51, %v2527_v49  ;;  %v3119_v31 = vld [vmem:[%s5252_s0 + $0x6e8] sm:$0xf]  ;;  %v3412_v36 = vld [vmem:[%s5252_s0 + $0x5f4] sm:$0xf0]  ;;  %v2368_v39 = vor.u32 %v3256_v29, %v2367_v28 }
  0x8f   :  { %1917 = vmatpush.bf16.msra.mxu2 %v2576_v20  ;;  %v3288_v20 = vld [vmem:[%s5252_s0 + $0x214] sm:$0xf0]  ;;  %v2863_v33 = vld [vmem:[%s5252_s0 + $0x4e8] sm:$0xf]  ;;  %v3120_v40 = vor.u32 %v3444_v32, %v3119_v31  ;;  %v2737_v31 = vld [vmem:[%s5252_s0 + $0x3f8] sm:$0xf0] }
  0x90   :  { %1940 = vmatpush.bf16.msra.mxu3 %v2624_v42  ;;  %v2496_v37 = vor.u32 %v3288_v20, %v2495_v19  ;;  %v3103_v43 = vld [vmem:[%s5252_s0 + $0x6c8] sm:$0xf]  ;;  %v3440_v44 = vld [vmem:[%s5252_s0 + $0x6d4] sm:$0xf0] }
  0x91   :  { %1899 = vmatpush.bf16.msra.mxu1 %v2448_v24  ;;  %v3167_v24 = vld [vmem:[%s5252_s0 + $0x748] sm:$0xf]  ;;  %v3408_v49 = vld [vmem:[%s5252_s0 + $0x5d4] sm:$0xf0]  ;;  %v3104_v55 = vor.u32 %v3440_v44, %v3103_v43 }
  0x92   :  { %1881 = vmatpush.bf16.msra.mxu0 %v2320_v21  ;;  %v2512_v21 = vor.u32 %v3292_v12, %v2511_v7  ;;  %v3168_v30 = vor.u32 %v3456_v25, %v3167_v24  ;;  %v3452_v51 = vld [vmem:[%s5252_s0 + $0x734] sm:$0xf0]  ;;  %v3087_v63 = vld [vmem:[%s5252_s0 + $0x6a8] sm:$0xf] }
  0x93   :  { %1918 = vmatpush.bf16.msra.mxu2 %v2560_v34  ;;  %v3380_v34 = vld [vmem:[%s5252_s0 + $0x4f4] sm:$0xf0]  ;;  %v3135_v12 = vld [vmem:[%s5252_s0 + $0x708] sm:$0xf] }
  0x94   :  { %2008 = vmatpush.bf16.msrb.mxu3 %v1586_v45  ;;  %v2864_v41 = vor.u32 %v3380_v34, %v2863_v33  ;;  %v2847_v45 = vld [vmem:[%s5252_s0 + $0x4c8] sm:$0xf]  ;;  %v3436_v2 = vld [vmem:[%s5252_s0 + $0x6b4] sm:$0xf0] }
  0x95   :  { %1900 = vmatpush.bf16.msra.mxu1 %v2432_v38  ;;  %v2240_v38 = vor.u32 %v3224_v27, %v2239_v23  ;;  %v3088_v7 = vor.u32 %v3436_v2, %v3087_v63  ;;  %v3071_v16 = vld [vmem:[%s5252_s0 + $0x688] sm:$0xf]  ;;  %v3432_v17 = vld [vmem:[%s5252_s0 + $0x694] sm:$0xf0] }
  0x96   :  { %1882 = vmatpush.bf16.msra.mxu0 %v2304_v35  ;;  %1856 = vmatmul.bf16.gmra.mxu2 %v4158_v13  ;;  %v2991_v35 = vld [vmem:[%s5252_s0 + $0x5e8] sm:$0xf]  ;;  %v3448_v18 = vld [vmem:[%s5252_s0 + $0x714] sm:$0xf0]  ;;  %v3072_v24 = vor.u32 %v3432_v17, %v3071_v16 }
  0x97   :  { %1919 = vmatpush.bf16.msra.mxu2 %v2544_v46  ;;  %3208 = vmatmul.msk.bf16.gmra.mxu3 %vm1571_vm1, %v4160_v14  ;;  %v2992_v42 = vor.u32 %v3412_v36, %v2991_v35  ;;  %v3376_v46 = vld [vmem:[%s5252_s0 + $0x4d4] sm:$0xf0]  ;;  %v3136_v20 = vor.u32 %v3448_v18, %v3135_v12  ;;  %v2815_v23 = vld [vmem:[%s5252_s0 + $0x488] sm:$0xf] }
  0x98   :  { %2009 = vmatpush.bf16.msrb.mxu3 %v3184_v10  ;;  %1838 = vmatmul.bf16.gmra.mxu1 %v4147_v9  ;;  %v2848_v61 = vor.u32 %v3376_v46, %v2847_v45  ;;  %v2959_v10 = vld [vmem:[%s5252_s0 + $0x5a8] sm:$0xf]  ;;  %v3368_v25 = vld [vmem:[%s5252_s0 + $0x494] sm:$0xf0]  ;;  %v3342_v46 = vld [vmem:[%s5252_s0 + $0x3cc] sm:$0xf] }
  0x99   :  { %1901 = vmatpush.bf16.msra.mxu1 %v2416_v50  ;;  %1820 = vmatmul.bf16.gmra.mxu0 %v4145_v8  ;;  %v3151_v50 = vld [vmem:[%s5252_s0 + $0x728] sm:$0xf]  ;;  %v3400_v27 = vld [vmem:[%s5252_s0 + $0x594] sm:$0xf0]  ;;  %v2816_v32 = vor.u32 %v3368_v25, %v2815_v23 }
  0x9a   :  { %1883 = vmatpush.bf16.msra.mxu0 %v2288_v48  ;;  %v2975_v48 = vld [vmem:[%s5252_s0 + $0x5c8] sm:$0xf]  ;;  %v3152_v58 = vor.u32 %v3452_v51, %v3151_v50  ;;  %v3428_v29 = vld [vmem:[%s5252_s0 + $0x674] sm:$0xf0] }
  0x9b   :  { %1920 = vmatpush.bf16.msra.mxu2 %v2528_v3  ;;  %v2976_v62 = vor.u32 %v3408_v49, %v2975_v48  ;;  %v2831_v3 = vld [vmem:[%s5252_s0 + $0x4a8] sm:$0xf]  ;;  %v3424_v44 = vld [vmem:[%s5252_s0 + $0x654] sm:$0xf0]  ;;  %v2721_v48 = vld [vmem:[%s5252_s0 + $0x3d8] sm:$0xf0] }
  0x9c   :  { %2010 = vmatpush.bf16.msrb.mxu3 %v3168_v30  ;;  %v3055_v28 = vld [vmem:[%s5252_s0 + $0x668] sm:$0xf]  ;;  %v3346_v30 = vld [vmem:[%s5252_s0 + $0x3ec] sm:$0xf]  ;;  %v3392_v63 = vld [vmem:[%s5252_s0 + $0x554] sm:$0xf0] }
  0x9d   :  { %1902 = vmatpush.bf16.msra.mxu1 %v2400_v11  ;;  %v3404_v11 = vld [vmem:[%s5252_s0 + $0x5b4] sm:$0xf0]  ;;  %v2799_v34 = vld [vmem:[%s5252_s0 + $0x468] sm:$0xf]  ;;  %v2740_v35 = vor.u32 %v3346_v30, %v2737_v31  ;;  %v2609_v30 = vld [vmem:[%s5252_s0 + $0x2f8] sm:$0xf0] }
  0x9e   :  { %1884 = vmatpush.bf16.msra.mxu0 %v2272_v4  ;;  %v3372_v4 = vld [vmem:[%s5252_s0 + $0x4b4] sm:$0xf0]  ;;  %v3039_v43 = vld [vmem:[%s5252_s0 + $0x648] sm:$0xf]  ;;  %v3334_v31 = vld [vmem:[%s5252_s0 + $0x38c] sm:$0xf] }
  0x9f   :  { %1921 = vmatpush.bf16.msra.mxu2 %v2512_v21  ;;  %v2832_v21 = vor.u32 %v3372_v4, %v2831_v3  ;;  %v2783_v51 = vld [vmem:[%s5252_s0 + $0x448] sm:$0xf]  ;;  %v3420_v3 = vld [vmem:[%s5252_s0 + $0x634] sm:$0xf0]  ;;  %v3338_v4 = vld [vmem:[%s5252_s0 + $0x3ac] sm:$0xf] }
  0xa0   :  { %2011 = vmatpush.bf16.msrb.mxu3 %v3152_v58  ;;  %v3040_v58 = vor.u32 %v3424_v44, %v3039_v43  ;;  %v3023_v2 = vld [vmem:[%s5252_s0 + $0x628] sm:$0xf]  ;;  %v3250_v43 = vld [vmem:[%s5252_s0 + $0xec] sm:$0xf]  ;;  %v2353_v44 = vld [vmem:[%s5252_s0 + $0xf8] sm:$0xf0] }
  0xa1   :  { %1903 = vmatpush.bf16.msra.mxu1 %v2384_v26  ;;  %v4669_v19 = vpop.f32.mrf.mxu1  ;;  %v2943_v26 = vld [vmem:[%s5252_s0 + $0x588] sm:$0xf]  ;;  %v3024_v18 = vor.u32 %v3420_v3, %v3023_v2  ;;  %v2356_v3 = vor.u32 %v3250_v43, %v2353_v44 }
  0xa2   :  { %1885 = vmatpush.bf16.msra.mxu0 %v2256_v22  ;;  %v4658_v15 = vpop.f32.mrf.mxu0  ;;  %v2960_v22 = vor.u32 %v3404_v11, %v2959_v10  ;;  %v2944_v33 = vor.u32 %v3400_v27, %v2943_v26  ;;  %v2767_v12 = vld [vmem:[%s5252_s0 + $0x428] sm:$0xf]  ;;  %v3416_v26 = vld [vmem:[%s5252_s0 + $0x614] sm:$0xf0]  ;;  %v3314_v27 = vld [vmem:[%s5252_s0 + $0x2ec] sm:$0xf] }
  0xa3   :  { %1922 = vmatpush.bf16.msra.mxu2 %v2496_v37  ;;  %v3056_v37 = vor.u32 %v3428_v29, %v3055_v28  ;;  %v3007_v25 = vld [vmem:[%s5252_s0 + $0x608] sm:$0xf]  ;;  %v4782_v28 = vpop.permute.xlu0 %276 }
  0xa4   :  { %2012 = vmatpush.bf16.msrb.mxu3 %v3136_v20  ;;  %v3356_v20 = vld [vmem:[%s5252_s0 + $0x434] sm:$0xf0] }
  0xa5   :  { %1904 = vmatpush.bf16.msra.mxu1 %v2368_v39  ;;  %v2927_v39 = vld [vmem:[%s5252_s0 + $0x568] sm:$0xf] }
  0xa6   :  { %1886 = vmatpush.bf16.msra.mxu0 %v2240_v38  ;;  %1923 = vmatmul.bf16.vlgmr.msra.gmra.mxu2 %v3766_v57  ;;  %v3364_v38 = vld [vmem:[%s5252_s0 + $0x474] sm:$0xf0] }
  0xa7   :  { %1987 = vmatpush.bf16.msrb.mxu2 %v3120_v40  ;;  %1941 = vmatmul.bf16.vlgmr.msra.gmra.mxu3 %v3774_v60  ;;  %v3396_v40 = vld [vmem:[%s5252_s0 + $0x574] sm:$0xf0]  ;;  %v2800_v49 = vor.u32 %v3364_v38, %v2799_v34  ;;  %v2879_v38 = vld [vmem:[%s5252_s0 + $0x508] sm:$0xf] }
  0xa8   :  { %1905 = vmatmul.bf16.vlgmr.msra.gmra.mxu1 %v3764_v56  ;;  %v4702_v36 = vpop.f32.mrf.mxu2  ;;  %2077 = vmatpush.bf16.msra.mxu3 %v2740_v35  ;;  %v2928_v50 = vor.u32 %v3396_v40, %v2927_v39  ;;  %v2751_v35 = vld [vmem:[%s5252_s0 + $0x408] sm:$0xf]  ;;  %v3008_v39 = vor.u32 %v3416_v26, %v3007_v25  ;;  %v3384_v40 = vld [vmem:[%s5252_s0 + $0x514] sm:$0xf0] }
  0xa9   :  { %1969 = vmatpush.bf16.msrb.mxu1 %v2992_v42  ;;  %1887 = vmatmul.bf16.vlgmr.msra.gmra.mxu0 %v3756_v52  ;;  %v4723_v45 = vpop.f32.mrf.mxu1 }
  0xaa   :  { %1951 = vmatpush.bf16.msrb.mxu0 %v2864_v41  ;;  %v4713_v41 = vpop.f32.mrf.mxu3  ;;  %v4715_v42 = vpop.f32.mrf.mxu0 }
  0xab   :  { %1988 = vmatpush.bf16.msrb.mxu2 %v3104_v55  ;;  %v2724_v55 = vor.u32 %v3342_v46, %v2721_v48  ;;  %v2612_v48 = vor.u32 %v3314_v27, %v2609_v30  ;;  %v2577_v27 = vld [vmem:[%s5252_s0 + $0x2b8] sm:$0xf0]  ;;  %v3326_v30 = vld [vmem:[%s5252_s0 + $0x34c] sm:$0xf] }
  0xad   :  { %1970 = vmatpush.bf16.msrb.mxu1 %v2976_v62  ;;  %v2911_v62 = vld [vmem:[%s5252_s0 + $0x548] sm:$0xf]  ;;  %2078 = vmatpush.bf16.msra.mxu3 %v2724_v55  ;;  %v1601_v55 = vadd.f32 %v4658_v15, %v4782_v28  ;;  %v2880_v15 = vor.u32 %v3384_v40, %v2879_v38  ;;  %v3274_v38 = vld [vmem:[%s5252_s0 + $0x1ac] sm:$0xf] }
  0xae   :  { %1952 = vmatpush.bf16.msrb.mxu0 %v2848_v61  ;;  %v3360_v61 = vld [vmem:[%s5252_s0 + $0x454] sm:$0xf0]  ;;  %v2912_v11 = vor.u32 %v3392_v63, %v2911_v62  ;;  %v2673_v62 = vld [vmem:[%s5252_s0 + $0x378] sm:$0xf0] }
  0xaf   :  { %1989 = vmatpush.bf16.msrb.mxu2 %v3088_v7  ;;  %v2705_v7 = vld [vmem:[%s5252_s0 + $0x3b8] sm:$0xf0]  ;;  %v2784_v10 = vor.u32 %v3360_v61, %v2783_v51  ;;  %v3310_v51 = vld [vmem:[%s5252_s0 + $0x2cc] sm:$0xf]  ;;  %v1619_v25 = vadd.f32 %v4669_v19, %v1601_v55 }
  0xb0   :  { %v2708_v16 = vor.u32 %v3338_v4, %v2705_v7  ;;  %v4758_v17 = vpop.f32.mrf.mxu2  ;;  %v3330_v61 = vld [vmem:[%s5252_s0 + $0x36c] sm:$0xf]  ;;  %v2641_v55 = vld [vmem:[%s5252_s0 + $0x338] sm:$0xf0] }
  0xb1   :  { %1971 = vmatpush.bf16.msrb.mxu1 %v2960_v22  ;;  %v3388_v22 = vld [vmem:[%s5252_s0 + $0x534] sm:$0xf0]  ;;  %v3246_v7 = vld [vmem:[%s5252_s0 + $0xcc] sm:$0xf]  ;;  %v1637_v43 = vadd.f32 %v4702_v36, %v1619_v25 }
  0xb2   :  { %1953 = vmatpush.bf16.msrb.mxu0 %v2832_v21  ;;  %v2895_v21 = vld [vmem:[%s5252_s0 + $0x528] sm:$0xf]  ;;  %v4769_v23 = vpop.f32.mrf.mxu3  ;;  %2079 = vmatpush.bf16.msra.mxu3 %v2708_v16  ;;  %v3238_v36 = vld [vmem:[%s5252_s0 + $0x8c] sm:$0xf] }
  0xb3   :  { %1990 = vmatpush.bf16.msrb.mxu2 %v3072_v24  ;;  %v2896_v34 = vor.u32 %v3388_v22, %v2895_v21  ;;  %v3306_v21 = vld [vmem:[%s5252_s0 + $0x2ac] sm:$0xf]  ;;  %v2676_v22 = vor.u32 %v3330_v61, %v2673_v62  ;;  %v2305_v61 = vld [vmem:[%s5252_s0 + $0x98] sm:$0xf0] }
  0xb4   :  { %v4771_v24 = vpop.f32.mrf.mxu0  ;;  %v3270_v62 = vld [vmem:[%s5252_s0 + $0x18c] sm:$0xf] }
  0xb5   :  { %1972 = vmatpush.bf16.msrb.mxu1 %v2944_v33  ;;  %v4784_v29 = vpop.f32.mrf.mxu1  ;;  %v2768_v33 = vor.u32 %v3356_v20, %v2767_v12  ;;  %v2465_v20 = vld [vmem:[%s5252_s0 + $0x1d8] sm:$0xf0]  ;;  %v3318_v25 = vld [vmem:[%s5252_s0 + $0x30c] sm:$0xf] }
  0xb6   :  { %1954 = vmatpush.bf16.msrb.mxu0 %v2816_v32  ;;  %v2689_v32 = vld [vmem:[%s5252_s0 + $0x398] sm:$0xf0]  ;;  %1928 = vmatmul.bf16.gmra.mxu2 %v3887_v54 }
  0xb7   :  { %1991 = vmatpush.bf16.msrb.mxu2 %v3056_v37  ;;  %v3352_v37 = vld [vmem:[%s5252_s0 + $0x414] sm:$0xf0]  ;;  %v2692_v46 = vor.u32 %v3334_v31, %v2689_v32  ;;  %1946 = vmatmul.bf16.gmra.mxu3 %v3895_v59  ;;  %v2657_v31 = vld [vmem:[%s5252_s0 + $0x358] sm:$0xf0]  ;;  %v4866_v32 = vpop.permute.xlu0 %281 }
  0xb8   :  { %1910 = vmatmul.bf16.gmra.mxu1 %v3885_v53  ;;  %v2752_v63 = vor.u32 %v3352_v37, %v2751_v35  ;;  %v4837_v2 = vpop.f32.mrf.mxu2  ;;  %v2580_v35 = vor.u32 %v3306_v21, %v2577_v27  ;;  %v2321_v37 = vld [vmem:[%s5252_s0 + $0xb8] sm:$0xf0]  ;;  %v2660_v40 = vor.u32 %v3326_v30, %v2657_v31  ;;  %v1603_v44 = vadd.f32 %v4715_v42, %v4866_v32  ;;  %v3322_v42 = vld [vmem:[%s5252_s0 + $0x32c] sm:$0xf] }
  0xb9   :  { %1973 = vmatpush.bf16.msrb.mxu1 %v2928_v50  ;;  %1892 = vmatmul.bf16.gmra.mxu0 %v3874_v47  ;;  %v2481_v50 = vld [vmem:[%s5252_s0 + $0x1f8] sm:$0xf0]  ;;  %v3266_v30 = vld [vmem:[%s5252_s0 + $0x16c] sm:$0xf] }
  0xba   :  { %1955 = vmatpush.bf16.msrb.mxu0 %v2800_v49  ;;  %v3282_v49 = vld [vmem:[%s5252_s0 + $0x1ec] sm:$0xf]  ;;  %2080 = vmatpush.bf16.msra.mxu3 %v2692_v46  ;;  %v2289_v27 = vld [vmem:[%s5252_s0 + $0x78] sm:$0xf0] }
  0xbb   :  { %1992 = vmatpush.bf16.msrb.mxu2 %v3040_v58  ;;  %v2593_v58 = vld [vmem:[%s5252_s0 + $0x2d8] sm:$0xf0]  ;;  %v2484_v4 = vor.u32 %v3282_v49, %v2481_v50  ;;  %v3302_v46 = vld [vmem:[%s5252_s0 + $0x28c] sm:$0xf] }
  0xbc   :  { %v1607_v12 = vpop.f32.mrf.mxu0  ;;  %v2596_v16 = vor.u32 %v3310_v51, %v2593_v58  ;;  %v2417_v31 = vld [vmem:[%s5252_s0 + $0x178] sm:$0xf0] }
  0xbd   :  { %1974 = vmatpush.bf16.msrb.mxu1 %v2912_v11  ;;  %v4845_v11 = vpop.f32.mrf.mxu3  ;;  %v1625_v26 = vpop.f32.mrf.mxu1 }
  0xbe   :  { %1956 = vmatpush.bf16.msrb.mxu0 %v2784_v10  ;;  %v2337_v10 = vld [vmem:[%s5252_s0 + $0xd8] sm:$0xf0]  ;;  %2081 = vmatpush.bf16.msra.mxu3 %v2676_v22 }
  0xbf   :  { %1993 = vmatpush.bf16.msrb.mxu2 %v3024_v18  ;;  %v3278_v18 = vld [vmem:[%s5252_s0 + $0x1cc] sm:$0xf]  ;;  %v2340_v19 = vor.u32 %v3246_v7, %v2337_v10  ;;  %v1621_v7 = vadd.f32 %v4723_v45, %v1603_v44  ;;  %v4909_v10 = vpop.permute.xlu1 %286  ;;  %v2625_v26 = vld [vmem:[%s5252_s0 + $0x318] sm:$0xf0] }
  0xc0   :  { %v1643_v49 = vpop.f32.mrf.mxu2  ;;  %v3234_v45 = vld [vmem:[%s5252_s0 + $0x6c] sm:$0xf]  ;;  %v2529_v44 = vld [vmem:[%s5252_s0 + $0x258] sm:$0xf0] }
  0xc1   :  { %1975 = vmatpush.bf16.msrb.mxu1 %v2896_v34  ;;  %v3242_v34 = vld [vmem:[%s5252_s0 + $0xac] sm:$0xf] }
  0xc2   :  { %1957 = vmatpush.bf16.msrb.mxu0 %v2768_v33  ;;  %v2468_v33 = vor.u32 %v3278_v18, %v2465_v20  ;;  %v2324_v50 = vor.u32 %v3242_v34, %v2321_v37  ;;  %2082 = vmatpush.bf16.msra.mxu3 %v2660_v40  ;;  %v2545_v18 = vld [vmem:[%s5252_s0 + $0x278] sm:$0xf0]  ;;  %v2644_v20 = vor.u32 %v3322_v42, %v2641_v55  ;;  %v3462_v34 = vld [vmem:[%s5252_s0 + $0x78c] sm:$0xf] }
  0xc3   :  { %1994 = vmatpush.bf16.msrb.mxu2 %v3008_v39  ;;  %v2449_v39 = vld [vmem:[%s5252_s0 + $0x1b8] sm:$0xf0]  ;;  %v2292_v40 = vor.u32 %v3234_v45, %v2289_v27 }
  0xc4   :  { %v2452_v51 = vor.u32 %v3274_v38, %v2449_v39  ;;  %v3185_v45 = vld [vmem:[%s5252_s0 + $0x778] sm:$0xf0] }
  0xc5   :  { %1976 = vmatpush.bf16.msrb.mxu1 %v2880_v15  ;;  %v1661_v58 = vpop.f32.mrf.mxu3  ;;  %v1655_v15 = vadd.f32 %v4713_v41, %v1637_v43  ;;  %v2308_v41 = vor.u32 %v3238_v36, %v2305_v61  ;;  %v2420_v43 = vor.u32 %v3266_v30, %v2417_v31  ;;  %v2401_v36 = vld [vmem:[%s5252_s0 + $0x158] sm:$0xf0] }
  0xc6   :  { %1958 = vmatpush.bf16.msrb.mxu0 %v2752_v63  ;;  %v2433_v63 = vld [vmem:[%s5252_s0 + $0x198] sm:$0xf0]  ;;  %1995 = vmatmul.bf16.vlgmr.msrb.gmra.mxu2 %v4037_v5 }
  0xc7   :  { %2059 = vmatpush.bf16.msra.mxu2 %v2612_v48  ;;  %v2561_v48 = vld [vmem:[%s5252_s0 + $0x298] sm:$0xf0]  ;;  %v2436_v22 = vor.u32 %v3270_v62, %v2433_v63  ;;  %3209 = vmatmul.msk.bf16.vlgmr.msrb.gmra.mxu3 %vm1571_vm1, %v4039_v6 }
  0xc8   :  { %v2564_v12 = vor.u32 %v3302_v46, %v2561_v48  ;;  %1977 = vmatmul.bf16.vlgmr.msrb.gmra.mxu1 %v4026_v1  ;;  %2083 = vmatpush.bf16.msra.mxu3 %v2644_v20  ;;  %v3230_v46 = vld [vmem:[%s5252_s0 + $0x4c] sm:$0xf]  ;;  %v2273_v48 = vld [vmem:[%s5252_s0 + $0x58] sm:$0xf0] }
  0xc9   :  { %2041 = vmatpush.bf16.msra.mxu1 %v2484_v4  ;;  %v1690_v4 = vpop.f32.mrf.mxu1  ;;  %1959 = vmatmul.bf16.vlgmr.msrb.gmra.mxu0 %v4024_v0  ;;  %v1708_v49 = vpop.f32.mrf.mxu2  ;;  %v3258_v20 = vld [vmem:[%s5252_s0 + $0x12c] sm:$0xf] }
  0xca   :  { %2023 = vmatpush.bf16.msra.mxu0 %v2356_v3  ;;  %v1672_v3 = vpop.f32.mrf.mxu0 }
  0xcb   :  { %2060 = vmatpush.bf16.msra.mxu2 %v2596_v16  ;;  %v3298_v16 = vld [vmem:[%s5252_s0 + $0x26c] sm:$0xf]  ;;  %v1673_v21 = vadd.f32 %v1672_v3, %v1655_v15  ;;  %v2276_v3 = vor.u32 %v3230_v46, %v2273_v48  ;;  %v3121_v46 = vld [vmem:[%s5252_s0 + $0x6f8] sm:$0xf0] }
  0xcc   :  { %v2548_v37 = vor.u32 %v3298_v16, %v2545_v18  ;;  %v3226_v16 = vld [vmem:[%s5252_s0 + $0x2c] sm:$0xf]  ;;  %v2257_v18 = vld [vmem:[%s5252_s0 + $0x38] sm:$0xf0] }
  0xcd   :  { %2042 = vmatpush.bf16.msra.mxu1 %v2468_v33  ;;  %v1606_v33 = vadd.f32 %v4771_v24, %v4909_v10  ;;  %v2628_v24 = vor.u32 %v3318_v25, %v2625_v26  ;;  %v1691_v39 = vadd.f32 %v1690_v4, %v1673_v21  ;;  %v2385_v21 = vld [vmem:[%s5252_s0 + $0x138] sm:$0xf0]  ;;  %v3286_v26 = vld [vmem:[%s5252_s0 + $0x20c] sm:$0xf] }
  0xce   :  { %2024 = vmatpush.bf16.msra.mxu0 %v2340_v19  ;;  %v1639_v19 = vadd.f32 %v4758_v17, %v1621_v7  ;;  %v3294_v17 = vld [vmem:[%s5252_s0 + $0x24c] sm:$0xf]  ;;  %v2388_v31 = vor.u32 %v3258_v20, %v2385_v21  ;;  %v2977_v20 = vld [vmem:[%s5252_s0 + $0x5d8] sm:$0xf0] }
  0xcf   :  { %2061 = vmatpush.bf16.msra.mxu2 %v2580_v35  ;;  %v3201_v35 = vld [vmem:[%s5252_s0 + $0x798] sm:$0x30]  ;;  %v1624_v55 = vadd.f32 %v4784_v29, %v1606_v33  ;;  %v1709_v58 = vadd.f32 %v1708_v49, %v1691_v39  ;;  %v2532_v15 = vor.u32 %v3294_v17, %v2529_v44  ;;  %2084 = vmatpush.bf16.msra.mxu3 %v2628_v24  ;;  %v3222_v33 = vld [vmem:[%s5252_s0 + $0xc] sm:$0xf] }
  0xd0   :  { %v3204_v38 = vor.u32 %v3462_v34, %v3201_v35  ;;  %v1657_v42 = vadd.f32 %v4769_v23, %v1639_v19  ;;  %v3290_v23 = vld [vmem:[%s5252_s0 + $0x22c] sm:$0xf]  ;;  %v2513_v29 = vld [vmem:[%s5252_s0 + $0x238] sm:$0xf0] }
  0xd1   :  { %2043 = vmatpush.bf16.msra.mxu1 %v2452_v51  ;;  %v3262_v51 = vld [vmem:[%s5252_s0 + $0x14c] sm:$0xf]  ;;  %v1692_v62 = vpop.f32.mrf.mxu1  ;;  %v2516_v25 = vor.u32 %v3290_v23, %v2513_v29  ;;  %v2497_v19 = vld [vmem:[%s5252_s0 + $0x218] sm:$0xf0]  ;;  %v1710_v35 = vpop.f32.mrf.mxu2 }
  0xd2   :  { %2025 = vmatpush.bf16.msra.mxu0 %v2324_v50  ;;  %v1726_v50 = vpop.f32.mrf.mxu3  ;;  %v1674_v61 = vpop.f32.mrf.mxu0  ;;  %v1589_v63 = vsel %vm1578_vm0, %v3204_v38, 0  ;;  %v2241_v34 = vld [vmem:[%s5252_s0 + $0x18] sm:$0xf0]  ;;  %v3254_v17 = vld [vmem:[%s5252_s0 + $0x10c] sm:$0xf] }
  0xd3   :  { %2062 = vmatpush.bf16.msra.mxu2 %v2564_v12  ;;  %v1727_v4 = vadd.f32 %v1726_v50, %v1709_v58  ;;  %v1675_v7 = vadd.f32 %v1674_v61, %v1657_v42  ;;  %v2404_v12 = vor.u32 %v3262_v51, %v2401_v36  ;;  %2152 = vmatpush.bf16.msrb.mxu3 %v1589_v63  ;;  %v2369_v24 = vld [vmem:[%s5252_s0 + $0x118] sm:$0xf0]  ;;  %v3442_v38 = vld [vmem:[%s5252_s0 + $0x6ec] sm:$0xf] }
  0xd4   :  { %v3378_v48 = vld [vmem:[%s5252_s0 + $0x4ec] sm:$0xf]  ;;  %v2865_v49 = vld [vmem:[%s5252_s0 + $0x4f8] sm:$0xf0]  ;;  %v2500_v50 = vor.u32 %v3286_v26, %v2497_v19  ;;  %v2244_v51 = vor.u32 %v3222_v33, %v2241_v34  ;;  %v2372_v61 = vor.u32 %v3254_v17, %v2369_v24 }
  0xd5   :  { %2044 = vmatpush.bf16.msra.mxu1 %v2436_v22  ;;  %3468 = vtanh.f32 %v1727_v4  ;;  %v3458_v22 = vld [vmem:[%s5252_s0 + $0x76c] sm:$0xf]  ;;  %v1693_v30 = vadd.f32 %v1692_v62, %v1675_v7  ;;  %v2993_v36 = vld [vmem:[%s5252_s0 + $0x5f8] sm:$0xf0]  ;;  %v3124_v62 = vor.u32 %v3442_v38, %v3121_v46  ;;  %v2868_v63 = vor.u32 %v3378_v48, %v2865_v49 }
  0xd6   :  { %2026 = vmatpush.bf16.msra.mxu0 %v2308_v41  ;;  %v1642_v41 = vadd.f32 %v4837_v2, %v1624_v55  ;;  %v3188_v27 = vor.u32 %v3458_v22, %v3185_v45  ;;  %v2260_v2 = vor.u32 %v3226_v16, %v2257_v18  ;;  %v3169_v4 = vld [vmem:[%s5252_s0 + $0x758] sm:$0xf0]  ;;  %2000 = vmatmul.bf16.gmra.mxu2 %v4158_v13  ;;  %v3374_v23 = vld [vmem:[%s5252_s0 + $0x4cc] sm:$0xf] }
  0xd7   :  { %2063 = vmatpush.bf16.msra.mxu2 %v2548_v37  ;;  %3210 = vmatmul.msk.bf16.gmra.mxu3 %vm1571_vm1, %v4160_v14  ;;  %v2849_v29 = vld [vmem:[%s5252_s0 + $0x4d8] sm:$0xf0]  ;;  %v3406_v18 = vld [vmem:[%s5252_s0 + $0x5cc] sm:$0xf] }
  0xd8   :  { %2153 = vmatpush.bf16.msrb.mxu3 %v3188_v27  ;;  %v1660_v39 = vadd.f32 %v4845_v11, %v1642_v41  ;;  %v3410_v11 = vld [vmem:[%s5252_s0 + $0x5ec] sm:$0xf]  ;;  %1982 = vmatmul.bf16.gmra.mxu1 %v4147_v9  ;;  %v3089_v19 = vld [vmem:[%s5252_s0 + $0x6b8] sm:$0xf0] }
  0xd9   :  { %2045 = vmatpush.bf16.msra.mxu1 %v2420_v43  ;;  %v1695_v44 = vpop.f32.mrf.mxu1  ;;  %1964 = vmatmul.bf16.gmra.mxu0 %v4145_v8  ;;  %v2996_v7 = vor.u32 %v3410_v11, %v2993_v36  ;;  %v1713_v41 = vpop.f32.mrf.mxu2  ;;  %v3434_v26 = vld [vmem:[%s5252_s0 + $0x6ac] sm:$0xf]  ;;  %v2833_v34 = vld [vmem:[%s5252_s0 + $0x4b8] sm:$0xf0] }
  0xda   :  { %2027 = vmatpush.bf16.msra.mxu0 %v2292_v40  ;;  %v1728_v37 = vpop.f32.mrf.mxu3  ;;  %v1711_v40 = vadd.f32 %v1710_v35, %v1693_v30  ;;  %v1677_v43 = vpop.f32.mrf.mxu0  ;;  %v3370_v33 = vld [vmem:[%s5252_s0 + $0x4ac] sm:$0xf]  ;;  %v3073_v49 = vld [vmem:[%s5252_s0 + $0x698] sm:$0xf0] }
  0xdb   :  { %2064 = vmatpush.bf16.msra.mxu2 %v2532_v15  ;;  %v3469_v42 = vpop.eup %3468  ;;  %v1678_v58 = vadd.f32 %v1677_v43, %v1660_v39  ;;  %v3438_v15 = vld [vmem:[%s5252_s0 + $0x6cc] sm:$0xf]  ;;  %v3153_v39 = vld [vmem:[%s5252_s0 + $0x738] sm:$0xf0]  ;;  %v2836_v43 = vor.u32 %v3370_v33, %v2833_v34 }
  0xdc   :  { %v1729_v55 = vadd.f32 %v1728_v37, %v1711_v40  ;;  %2179 = vst [vmem:[%s5255_s3] sm:$0xff] %v3469_v42  ;;  %v3402_v35 = vld [vmem:[%s5252_s0 + $0x5ac] sm:$0xf]  ;;  %v2961_v37 = vld [vmem:[%s5252_s0 + $0x5b8] sm:$0xf0]  ;;  %v3092_v40 = vor.u32 %v3434_v26, %v3089_v19 }
  0xdd   :  { %2046 = vmatpush.bf16.msra.mxu1 %v2404_v12  ;;  %v3105_v12 = vld [vmem:[%s5252_s0 + $0x6d8] sm:$0xf0]  ;;  %v1696_v21 = vadd.f32 %v1695_v44, %v1678_v58  ;;  %v3450_v38 = vld [vmem:[%s5252_s0 + $0x72c] sm:$0xf]  ;;  %v2964_v46 = vor.u32 %v3402_v35, %v2961_v37 }
  0xde   :  { %2028 = vmatpush.bf16.msra.mxu0 %v2276_v3  ;;  %v3454_v3 = vld [vmem:[%s5252_s0 + $0x74c] sm:$0xf]  ;;  %3470 = vtanh.f32 %v1729_v55  ;;  %v3108_v45 = vor.u32 %v3438_v15, %v3105_v12  ;;  %v3156_v44 = vor.u32 %v3450_v38, %v3153_v39  ;;  %v2945_v58 = vld [vmem:[%s5252_s0 + $0x598] sm:$0xf0] }
  0xdf   :  { %2065 = vmatpush.bf16.msra.mxu2 %v2516_v25  ;;  %v3172_v16 = vor.u32 %v3454_v3, %v3169_v4  ;;  %v2852_v25 = vor.u32 %v3374_v23, %v2849_v29  ;;  %v1714_v27 = vadd.f32 %v1713_v41, %v1696_v21  ;;  %v3430_v48 = vld [vmem:[%s5252_s0 + $0x68c] sm:$0xf]  ;;  %v3057_v29 = vld [vmem:[%s5252_s0 + $0x678] sm:$0xf0] }
  0xe0   :  { %v3446_v11 = vld [vmem:[%s5252_s0 + $0x70c] sm:$0xf]  ;;  %v3076_v3 = vor.u32 %v3430_v48, %v3073_v49  ;;  %v2929_v21 = vld [vmem:[%s5252_s0 + $0x578] sm:$0xf0] }
  0xe1   :  { %2047 = vmatpush.bf16.msra.mxu1 %v2388_v31  ;;  %v2980_v31 = vor.u32 %v3406_v18, %v2977_v20  ;;  %2154 = vmatpush.bf16.msrb.mxu3 %v3172_v16  ;;  %v1715_v36 = vpop.f32.mrf.mxu2  ;;  %v3398_v55 = vld [vmem:[%s5252_s0 + $0x58c] sm:$0xf]  ;;  %v2801_v18 = vld [vmem:[%s5252_s0 + $0x478] sm:$0xf0] }
  0xe2   :  { %2029 = vmatpush.bf16.msra.mxu0 %v2260_v2  ;;  %v1731_v22 = vpop.f32.mrf.mxu3  ;;  %v1679_v30 = vpop.f32.mrf.mxu0  ;;  %v2948_v23 = vor.u32 %v3398_v55, %v2945_v58  ;;  %v3362_v16 = vld [vmem:[%s5252_s0 + $0x46c] sm:$0xf]  ;;  %v3025_v37 = vld [vmem:[%s5252_s0 + $0x638] sm:$0xf0] }
  0xe3   :  { %2066 = vmatpush.bf16.msra.mxu2 %v2500_v50  ;;  %v1697_v2 = vpop.f32.mrf.mxu1  ;;  %v1732_v24 = vadd.f32 %v1731_v22, %v1714_v27  ;;  %v3366_v50 = vld [vmem:[%s5252_s0 + $0x48c] sm:$0xf]  ;;  %v2804_v22 = vor.u32 %v3362_v16, %v2801_v18  ;;  %v2913_v30 = vld [vmem:[%s5252_s0 + $0x558] sm:$0xf0] }
  0xe4   :  { %v3471_v17 = vpop.eup %3470  ;;  %v3394_v20 = vld [vmem:[%s5252_s0 + $0x56c] sm:$0xf]  ;;  %v2897_v39 = vld [vmem:[%s5252_s0 + $0x538] sm:$0xf0] }
  0xe5   :  { %2048 = vmatpush.bf16.msra.mxu1 %v2372_v61  ;;  %2184 = vst [vmem:[%s5255_s3 + $0x20] sm:$0xff] %v3471_v17  ;;  %3472 = vtanh.f32 %v1732_v24  ;;  %2155 = vmatpush.bf16.msrb.mxu3 %v3156_v44  ;;  %v3137_v61 = vld [vmem:[%s5252_s0 + $0x718] sm:$0xf0]  ;;  %v3390_v27 = vld [vmem:[%s5252_s0 + $0x54c] sm:$0xf] }
  0xe6   :  { %2030 = vmatpush.bf16.msra.mxu0 %v2244_v51  ;;  %v2817_v51 = vld [vmem:[%s5252_s0 + $0x498] sm:$0xf0]  ;;  %v3140_v15 = vor.u32 %v3446_v11, %v3137_v61  ;;  %2067 = vmatmul.bf16.vlgmr.msra.gmra.mxu2 %v3766_v57  ;;  %v3358_v57 = vld [vmem:[%s5252_s0 + $0x44c] sm:$0xf]  ;;  %v2916_v35 = vor.u32 %v3390_v27, %v2913_v30 }
  0xe7   :  { %2131 = vmatpush.bf16.msrb.mxu2 %v3124_v62  ;;  %v2820_v4 = vor.u32 %v3366_v50, %v2817_v51  ;;  %2085 = vmatmul.bf16.vlgmr.msra.gmra.mxu3 %v3774_v60  ;;  %v2785_v60 = vld [vmem:[%s5252_s0 + $0x458] sm:$0xf0]  ;;  %v3418_v34 = vld [vmem:[%s5252_s0 + $0x62c] sm:$0xf] }
  0xe8   :  { %2049 = vmatmul.bf16.vlgmr.msra.gmra.mxu1 %v3764_v56  ;;  %v2932_v56 = vor.u32 %v3394_v20, %v2929_v21  ;;  %v2788_v33 = vor.u32 %v3358_v57, %v2785_v60  ;;  %v3354_v17 = vld [vmem:[%s5252_s0 + $0x42c] sm:$0xf]  ;;  %v2769_v24 = vld [vmem:[%s5252_s0 + $0x438] sm:$0xf0] }
  0xe9   :  { %2113 = vmatpush.bf16.msrb.mxu1 %v2996_v7  ;;  %v3426_v7 = vld [vmem:[%s5252_s0 + $0x66c] sm:$0xf]  ;;  %2156 = vmatpush.bf16.msrb.mxu3 %v3140_v15  ;;  %v3009_v48 = vld [vmem:[%s5252_s0 + $0x618] sm:$0xf0] }
  0xea   :  { %2095 = vmatpush.bf16.msrb.mxu0 %v2868_v63  ;;  %v1733_v42 = vpop.f32.mrf.mxu3  ;;  %v5115_v62 = vpop.f32.mrf.mxu0  ;;  %v3060_v41 = vor.u32 %v3426_v7, %v3057_v29  ;;  %v3386_v38 = vld [vmem:[%s5252_s0 + $0x52c] sm:$0xf]  ;;  %v2753_v50 = vld [vmem:[%s5252_s0 + $0x418] sm:$0xf0] }
  0xeb   :  { %2132 = vmatpush.bf16.msrb.mxu2 %v3108_v45  ;;  %v5117_v63 = vpop.f32.mrf.mxu1  ;;  %v3473_v12 = vpop.eup %3472  ;;  %2031 = vmatmul.bf16.vlgmr.msra.gmra.mxu0 %v3756_v52  ;;  %v3422_v52 = vld [vmem:[%s5252_s0 + $0x64c] sm:$0xf]  ;;  %v3041_v45 = vld [vmem:[%s5252_s0 + $0x658] sm:$0xf0] }
  0xec   :  { %2188 = vst [vmem:[%s5255_s3 + $0x40] sm:$0xf] %v3473_v12  ;;  %v3044_v19 = vor.u32 %v3422_v52, %v3041_v45  ;;  %v3414_v44 = vld [vmem:[%s5252_s0 + $0x60c] sm:$0xf]  ;;  %v2881_v42 = vld [vmem:[%s5252_s0 + $0x518] sm:$0xf0] }
  0xed   :  { %2114 = vmatpush.bf16.msrb.mxu1 %v2980_v31  ;;  %v3350_v49 = vld [vmem:[%s5252_s0 + $0x40c] sm:$0xf]  ;;  %v3012_v61 = vor.u32 %v3414_v44, %v3009_v48 }
  0xee   :  { %2096 = vmatpush.bf16.msrb.mxu0 %v2852_v25  ;;  %v1780_v25 = vpop.f32.mrf.mxu2  ;;  %v3382_v36 = vld [vmem:[%s5252_s0 + $0x50c] sm:$0xf]  ;;  %v2756_v15 = vor.u32 %v3350_v49, %v2753_v50 }
  0xef   :  { %2133 = vmatpush.bf16.msrb.mxu2 %v3092_v40  ;;  %v3028_v40 = vor.u32 %v3418_v34, %v3025_v37 }
  0xf1   :  { %2115 = vmatpush.bf16.msrb.mxu1 %v2964_v46  ;;  %v2900_v46 = vor.u32 %v3386_v38, %v2897_v39 }
  0xf2   :  { %2097 = vmatpush.bf16.msrb.mxu0 %v2836_v43  ;;  %v1798_v26 = vpop.f32.mrf.mxu3  ;;  %v1746_v2 = vpop.f32.mrf.mxu0  ;;  %v2772_v43 = vor.u32 %v3354_v17, %v2769_v24 }
  0xf3   :  { %2134 = vmatpush.bf16.msrb.mxu2 %v3076_v3  ;;  %v1764_v31 = vpop.f32.mrf.mxu1  ;;  %v2884_v3 = vor.u32 %v3382_v36, %v2881_v42 }
  0xf5   :  { %2116 = vmatpush.bf16.msrb.mxu1 %v2948_v23 }
  0xf6   :  { %2098 = vmatpush.bf16.msrb.mxu0 %v2820_v4  ;;  %v1782_v51 = vpop.f32.mrf.mxu2  ;;  %v1745_v4 = vadd.f32 %v5115_v62, %v4782_v28  ;;  %2072 = vmatmul.bf16.gmra.mxu2 %v3887_v54 }
  0xf7   :  { %2135 = vmatpush.bf16.msrb.mxu2 %v3060_v41  ;;  %2090 = vmatmul.bf16.gmra.mxu3 %v3895_v59 }
  0xf8   :  { %2054 = vmatmul.bf16.gmra.mxu1 %v3885_v53  ;;  %v1763_v23 = vadd.f32 %v5117_v63, %v1745_v4 }
  0xf9   :  { %2117 = vmatpush.bf16.msrb.mxu1 %v2932_v56 }
  0xfa   :  { %2099 = vmatpush.bf16.msrb.mxu0 %v2804_v22  ;;  %v1800_v11 = vpop.f32.mrf.mxu3  ;;  %v1749_v55 = vpop.f32.mrf.mxu0  ;;  %v1781_v18 = vadd.f32 %v1780_v25, %v1763_v23 }
  0xfb   :  { %2136 = vmatpush.bf16.msrb.mxu2 %v3044_v19  ;;  %v1767_v58 = vpop.f32.mrf.mxu1  ;;  %2036 = vmatmul.bf16.gmra.mxu0 %v3874_v47  ;;  %v1747_v47 = vadd.f32 %v1746_v2, %v4866_v32  ;;  %v1750_v52 = vadd.f32 %v1749_v55, %v4909_v10 }
  0xfc   :  { %v1799_v21 = vadd.f32 %v1798_v26, %v1781_v18 }
  0xfd   :  { %2118 = vmatpush.bf16.msrb.mxu1 %v2916_v35  ;;  %v1765_v54 = vadd.f32 %v1764_v31, %v1747_v47  ;;  %v1768_v60 = vadd.f32 %v1767_v58, %v1750_v52 }
  0xfe   :  { %2100 = vmatpush.bf16.msrb.mxu0 %v2788_v33  ;;  %v1785_v7 = vpop.f32.mrf.mxu2 }
  0xff   :  { %2137 = vmatpush.bf16.msrb.mxu2 %v3028_v40  ;;  %v1783_v59 = vadd.f32 %v1782_v51, %v1765_v54  ;;  %v1786_v2 = vadd.f32 %v1785_v7, %v1768_v60 }
 0x101   :  { %2119 = vmatpush.bf16.msrb.mxu1 %v2900_v46  ;;  %v1801_v57 = vadd.f32 %v1800_v11, %v1783_v59 }
 0x102   :  { %2101 = vmatpush.bf16.msrb.mxu0 %v2772_v43  ;;  %v1803_v12 = vpop.f32.mrf.mxu3  ;;  %v1751_v29 = vpop.f32.mrf.mxu0 }
 0x103   :  { %2138 = vmatpush.bf16.msrb.mxu2 %v3012_v61  ;;  %v1769_v16 = vpop.f32.mrf.mxu1  ;;  %v1804_v33 = vadd.f32 %v1803_v12, %v1786_v2 }
 0x105   :  { %2120 = vmatpush.bf16.msrb.mxu1 %v2884_v3 }
 0x106   :  { %2102 = vmatpush.bf16.msrb.mxu0 %v2756_v15  ;;  %v1787_v53 = vpop.f32.mrf.mxu2  ;;  %2139 = vmatmul.bf16.vlgmr.msrb.gmra.mxu2 %v4037_v5 }
 0x107   :  { %3211 = vmatmul.msk.bf16.vlgmr.msrb.gmra.mxu3 %vm1571_vm1, %v4039_v6 }
 0x108   :  { %2121 = vmatmul.bf16.vlgmr.msrb.gmra.mxu1 %v4026_v1 }
 0x10a   :  { %v1805_v20 = vpop.f32.mrf.mxu3  ;;  %v1816_v62 = vpop.f32.mrf.mxu0 }
 0x10b   :  { %v1834_v41 = vpop.f32.mrf.mxu1  ;;  %v1817_v22 = vadd.f32 %v1816_v62, %v1799_v21  ;;  %2103 = vmatmul.bf16.vlgmr.msrb.gmra.mxu0 %v4024_v0 }
 0x10d   :  { %v1835_v63 = vadd.f32 %v1834_v41, %v1817_v22 }
 0x10e   :  { %v1852_v56 = vpop.f32.mrf.mxu2 }
 0x10f   :  { %v1853_v25 = vadd.f32 %v1852_v56, %v1835_v63 }
 0x112   :  { %v1870_v45 = vpop.f32.mrf.mxu3  ;;  %v1818_v26 = vpop.f32.mrf.mxu0 }
 0x113   :  { %v1836_v27 = vpop.f32.mrf.mxu1  ;;  %v1871_v30 = vadd.f32 %v1870_v45, %v1853_v25  ;;  %v1819_v0 = vadd.f32 %v1818_v26, %v1801_v57 }
 0x115   :  { %3474 = vtanh.f32 %v1871_v30  ;;  %v1837_v1 = vadd.f32 %v1836_v27, %v1819_v0 }
 0x116   :  { %v1854_v31 = vpop.f32.mrf.mxu2  ;;  %2144 = vmatmul.bf16.gmra.mxu2 %v4158_v13 }
 0x117   :  { %v1855_v5 = vadd.f32 %v1854_v31, %v1837_v1  ;;  %3212 = vmatmul.msk.bf16.gmra.mxu3 %vm1571_vm1, %v4160_v14 }
 0x118   :  { %2126 = vmatmul.bf16.gmra.mxu1 %v4147_v9 }
 0x11a   :  { %v1872_v19 = vpop.f32.mrf.mxu3  ;;  %v1821_v34 = vpop.f32.mrf.mxu0 }
 0x11b   :  { %v1839_v35 = vpop.f32.mrf.mxu1  ;;  %v3475_v6 = vpop.eup %3474  ;;  %v1873_v37 = vadd.f32 %v1872_v19, %v1855_v5  ;;  %v1822_v17 = vadd.f32 %v1821_v34, %v1804_v33  ;;  %2108 = vmatmul.bf16.gmra.mxu0 %v4145_v8 }
 0x11c   :  { %2180 = vst [vmem:[%s5255_s3 + $0x8] sm:$0xff] %v3475_v6 }
 0x11d   :  { %3476 = vtanh.f32 %v1873_v37  ;;  %v1840_v24 = vadd.f32 %v1839_v35, %v1822_v17 }
 0x11e   :  { %v1857_v38 = vpop.f32.mrf.mxu2 }
 0x11f   :  { %v1858_v40 = vadd.f32 %v1857_v38, %v1840_v24 }
 0x122   :  { %v1875_v39 = vpop.f32.mrf.mxu3  ;;  %v1823_v43 = vpop.f32.mrf.mxu0 }
 0x123   :  { %v1841_v44 = vpop.f32.mrf.mxu1  ;;  %v3477_v46 = vpop.eup %3476  ;;  %v1876_v48 = vadd.f32 %v1875_v39, %v1858_v40 }
 0x124   :  { %2185 = vst [vmem:[%s5255_s3 + $0x28] sm:$0xff] %v3477_v46 }
 0x125   :  { %3478 = vtanh.f32 %v1876_v48 }
 0x126   :  { %v1859_v8 = vpop.f32.mrf.mxu2 }
 0x12a   :  { %v1877_v9 = vpop.f32.mrf.mxu3  ;;  %v1888_v49 = vpop.f32.mrf.mxu0 }
 0x12b   :  { %v1906_v13 = vpop.f32.mrf.mxu1  ;;  %v3479_v50 = vpop.eup %3478  ;;  %v1889_v15 = vadd.f32 %v1888_v49, %v4782_v28 }
 0x12c   :  { %2189 = vst [vmem:[%s5255_s3 + $0x48] sm:$0xf] %v3479_v50 }
 0x12d   :  { %v1907_v7 = vadd.f32 %v1906_v13, %v1889_v15 }
 0x12e   :  { %v1924_v14 = vpop.f32.mrf.mxu2 }
 0x12f   :  { %v1925_v29 = vadd.f32 %v1924_v14, %v1907_v7 }
 0x132   :  { %v1942_v51 = vpop.f32.mrf.mxu3  ;;  %v1890_v11 = vpop.f32.mrf.mxu0 }
 0x133   :  { %v1908_v36 = vpop.f32.mrf.mxu1  ;;  %v1891_v16 = vadd.f32 %v1890_v11, %v4866_v32  ;;  %v1943_v53 = vadd.f32 %v1942_v51, %v1925_v29 }
 0x135   :  { %v1909_v62 = vadd.f32 %v1908_v36, %v1891_v16 }
 0x136   :  { %v1926_v42 = vpop.f32.mrf.mxu2 }
 0x137   :  { %v1927_v54 = vadd.f32 %v1926_v42, %v1909_v62 }
 0x13a   :  { %v1944_v55 = vpop.f32.mrf.mxu3  ;;  %v1893_v58 = vpop.f32.mrf.mxu0 }
 0x13b   :  { %v1911_v61 = vpop.f32.mrf.mxu1  ;;  %v1894_v22 = vadd.f32 %v1893_v58, %v4909_v10  ;;  %v1945_v56 = vadd.f32 %v1944_v55, %v1927_v54 }
 0x13d   :  { %v1912_v45 = vadd.f32 %v1911_v61, %v1894_v22 }
 0x13e   :  { %v1929_v3 = vpop.f32.mrf.mxu2 }
 0x13f   :  { %v1930_v30 = vadd.f32 %v1929_v3, %v1912_v45 }
 0x142   :  { %v1947_v4 = vpop.f32.mrf.mxu3  ;;  %v1895_v12 = vpop.f32.mrf.mxu0 }
 0x143   :  { %v1913_v23 = vpop.f32.mrf.mxu1  ;;  %v1948_v31 = vadd.f32 %v1947_v4, %v1930_v30 }
 0x146   :  { %v1931_v18 = vpop.f32.mrf.mxu2 }
 0x14a   :  { %v1949_v47 = vpop.f32.mrf.mxu3  ;;  %v1960_v20 = vpop.f32.mrf.mxu0 }
 0x14b   :  { %v1978_v21 = vpop.f32.mrf.mxu1  ;;  %v1961_v41 = vadd.f32 %v1960_v20, %v1943_v53 }
 0x14d   :  { %v1979_v59 = vadd.f32 %v1978_v21, %v1961_v41 }
 0x14e   :  { %v1996_v52 = vpop.f32.mrf.mxu2 }
 0x14f   :  { %v1997_v57 = vadd.f32 %v1996_v52, %v1979_v59 }
 0x152   :  { %v2014_v63 = vpop.f32.mrf.mxu3  ;;  %v1962_v60 = vpop.f32.mrf.mxu0 }
 0x153   :  { %v1980_v25 = vpop.f32.mrf.mxu1  ;;  %v2015_v26 = vadd.f32 %v2014_v63, %v1997_v57  ;;  %v1963_v27 = vadd.f32 %v1962_v60, %v1945_v56 }
 0x155   :  { %3480 = vtanh.f32 %v2015_v26  ;;  %v1981_v0 = vadd.f32 %v1980_v25, %v1963_v27 }
 0x156   :  { %v1998_v2 = vpop.f32.mrf.mxu2 }
 0x157   :  { %v1999_v19 = vadd.f32 %v1998_v2, %v1981_v0 }
 0x15a   :  { %v2016_v1 = vpop.f32.mrf.mxu3  ;;  %v1965_v33 = vpop.f32.mrf.mxu0 }
 0x15b   :  { %v1983_v5 = vpop.f32.mrf.mxu1  ;;  %v3481_v34 = vpop.eup %3480  ;;  %v2017_v35 = vadd.f32 %v2016_v1, %v1999_v19  ;;  %v1966_v6 = vadd.f32 %v1965_v33, %v1948_v31 }
 0x15c   :  { %2181 = vst [vmem:[%s5255_s3 + $0x10] sm:$0xff] %v3481_v34 }
 0x15d   :  { %3482 = vtanh.f32 %v2017_v35  ;;  %v1984_v37 = vadd.f32 %v1983_v5, %v1966_v6 }
 0x15e   :  { %v2001_v17 = vpop.f32.mrf.mxu2 }
 0x15f   :  { %v2002_v38 = vadd.f32 %v2001_v17, %v1984_v37 }
 0x162   :  { %v2019_v24 = vpop.f32.mrf.mxu3  ;;  %v1967_v39 = vpop.f32.mrf.mxu0 }
 0x163   :  { %v1985_v40 = vpop.f32.mrf.mxu1  ;;  %v3483_v43 = vpop.eup %3482  ;;  %v2020_v44 = vadd.f32 %v2019_v24, %v2002_v38 }
 0x164   :  { %2186 = vst [vmem:[%s5255_s3 + $0x30] sm:$0xff] %v3483_v43 }
 0x165   :  { %3484 = vtanh.f32 %v2020_v44 }
 0x166   :  { %v2003_v46 = vpop.f32.mrf.mxu2 }
 0x16a   :  { %v2021_v48 = vpop.f32.mrf.mxu3  ;;  %v2032_v8 = vpop.f32.mrf.mxu0 }
 0x16b   :  { %v2050_v9 = vpop.f32.mrf.mxu1  ;;  %v3485_v49 = vpop.eup %3484  ;;  %v2033_v58 = vadd.f32 %v2032_v8, %v4782_v28 }
 0x16c   :  { %2190 = vst [vmem:[%s5255_s3 + $0x50] sm:$0xf] %v3485_v49 }
 0x16d   :  { %v2051_v3 = vadd.f32 %v2050_v9, %v2033_v58 }
 0x16e   :  { %v2068_v13 = vpop.f32.mrf.mxu2 }
 0x16f   :  { %v2069_v12 = vadd.f32 %v2068_v13, %v2051_v3 }
 0x172   :  { %v2086_v50 = vpop.f32.mrf.mxu3  ;;  %v2034_v14 = vpop.f32.mrf.mxu0 }
 0x173   :  { %v2052_v51 = vpop.f32.mrf.mxu1  ;;  %v2035_v23 = vadd.f32 %v2034_v14, %v4866_v32  ;;  %v2087_v18 = vadd.f32 %v2086_v50, %v2069_v12 }
 0x175   :  { %v2053_v20 = vadd.f32 %v2052_v51, %v2035_v23 }
 0x176   :  { %v2070_v11 = vpop.f32.mrf.mxu2 }
 0x177   :  { %v2071_v62 = vadd.f32 %v2070_v11, %v2053_v20 }
 0x17a   :  { %v2088_v36 = vpop.f32.mrf.mxu3  ;;  %v2037_v42 = vpop.f32.mrf.mxu0 }
 0x17b   :  { %v2055_v55 = vpop.f32.mrf.mxu1  ;;  %v2038_v41 = vadd.f32 %v2037_v42, %v4909_v10  ;;  %v2089_v59 = vadd.f32 %v2088_v36, %v2071_v62 }
 0x17d   :  { %v2056_v52 = vadd.f32 %v2055_v55, %v2038_v41 }
 0x17e   :  { %v2073_v61 = vpop.f32.mrf.mxu2 }
 0x17f   :  { %v2074_v60 = vadd.f32 %v2073_v61, %v2056_v52 }
 0x182   :  { %v2091_v15 = vpop.f32.mrf.mxu3  ;;  %v2039_v4 = vpop.f32.mrf.mxu0 }
 0x183   :  { %v2057_v7 = vpop.f32.mrf.mxu1  ;;  %v2092_v30 = vadd.f32 %v2091_v15, %v2074_v60 }
 0x186   :  { %v2075_v29 = vpop.f32.mrf.mxu2 }
 0x18a   :  { %v2093_v16 = vpop.f32.mrf.mxu3  ;;  %v2104_v47 = vpop.f32.mrf.mxu0 }
 0x18b   :  { %v2122_v53 = vpop.f32.mrf.mxu1  ;;  %v2105_v21 = vadd.f32 %v2104_v47, %v2087_v18 }
 0x18d   :  { %v2123_v54 = vadd.f32 %v2122_v53, %v2105_v21 }
 0x18e   :  { %v2140_v28 = vpop.f32.mrf.mxu2 }
 0x18f   :  { %v2141_v63 = vadd.f32 %v2140_v28, %v2123_v54 }
 0x192   :  { %v2158_v22 = vpop.f32.mrf.mxu3  ;;  %v2106_v56 = vpop.f32.mrf.mxu0 }
 0x193   :  { %v2124_v45 = vpop.f32.mrf.mxu1  ;;  %v2159_v57 = vadd.f32 %v2158_v22, %v2141_v63  ;;  %v2107_v32 = vadd.f32 %v2106_v56, %v2089_v59 }
 0x195   :  { %3486 = vtanh.f32 %v2159_v57  ;;  %v2125_v25 = vadd.f32 %v2124_v45, %v2107_v32 }
 0x196   :  { %v2142_v26 = vpop.f32.mrf.mxu2 }
 0x197   :  { %v2143_v0 = vadd.f32 %v2142_v26, %v2125_v25 }
 0x19a   :  { %v2160_v27 = vpop.f32.mrf.mxu3  ;;  %v2109_v2 = vpop.f32.mrf.mxu0 }
 0x19b   :  { %v2127_v10 = vpop.f32.mrf.mxu1  ;;  %v3487_v1 = vpop.eup %3486  ;;  %v2161_v31 = vadd.f32 %v2160_v27, %v2143_v0  ;;  %v2110_v19 = vadd.f32 %v2109_v2, %v2092_v30 }
 0x19c   :  { %2183 = vst.msk [vmem:[%s5255_s3 + $0x18] sm:$0xff] %vm2182_vm2, %v3487_v1 }
 0x19d   :  { %3488 = vtanh.f32 %v2161_v31  ;;  %v2128_v33 = vadd.f32 %v2127_v10, %v2110_v19 }
 0x19e   :  { %v2145_v5 = vpop.f32.mrf.mxu2 }
 0x19f   :  { %v2146_v35 = vadd.f32 %v2145_v5, %v2128_v33 }
 0x1a2   :  { %v2163_v34 = vpop.f32.mrf.mxu3  ;;  %v2111_v6 = vpop.f32.mrf.mxu0 }
 0x1a3   :  { %v2129_v37 = vpop.f32.mrf.mxu1  ;;  %v3489_v17 = vpop.eup %3488  ;;  %v2164_v24 = vadd.f32 %v2163_v34, %v2146_v35 }
 0x1a4   :  { %2187 = vst.msk [vmem:[%s5255_s3 + $0x38] sm:$0xff] %vm2182_vm2, %v3489_v17 }
 0x1a5   :  { %3490 = vtanh.f32 %v2164_v24 }
 0x1a6   :  { %v2147_v38 = vpop.f32.mrf.mxu2 }
 0x1aa   :  { %v2165_v39 = vpop.f32.mrf.mxu3 }
 0x1ab   :  { %v3491_v40 = vpop.eup %3490 }
 0x1ac   :  { %2192 = vst.msk [vmem:[%s5255_s3 + $0x58] sm:$0xf] %vm2191_vm3, %v3491_v40 }

</bundles_post_ra>
